<compile_context>
chip_gen: v5e
topology: v5e:2x2
jax: 0.10.0
libtpu: 0.0.40
codegen_flags: <defaults>
</compile_context>

<pallas_src>
import itertools
import numpy as np

import jax
import jax.numpy as jnp
from jax import lax
from jax.experimental import pallas as pl
from jax.experimental.pallas import tpu as pltpu

# ----------------------------- module hyper-params -----------------------------
RCUT = 6.0
LMAX = 2
NMAX = 2
LOOP = 1
SPECIES = [0, 1]                      # compressed species indices
NS = len(SPECIES)
NO = int((3 ** LMAX - 1) / 2)         # = 4 for lmax=2
OIDX = []
for _i in range(LMAX):
    OIDX.extend([_i] * (2 * _i + 1))  # [0, 1, 1, 1]

PAIR_ROWS = 8                         # round_up(3 + NO, 8): dist, ang(NO), valid, jsym, pad


def _round_up(x, m):
    return ((x + m - 1) // m) * m


# ----------------------- host-side neighbor list (NumPy) -----------------------
def get_nn_np(symbols, positions, cell, pbc, cutoff=RCUT):
    """Faithful NumPy port of the PyTorch get_nn (dynamic shapes -> host)."""
    icell = np.linalg.pinv(cell)
    grid = np.zeros(3, dtype=np.int64)
    vals = (2.0 * cutoff * np.linalg.norm(icell, axis=0)).astype(np.int64) + 1
    grid[pbc] = vals[pbc]
    iidxs, jidxs, isymb, jsymb, disps, dists = [], [], [], [], [], []
    for n1, n2, n3 in itertools.product(
            range(0, int(grid[0]) + 1),
            range(-int(grid[1]), int(grid[1]) + 1),
            range(-int(grid[2]), int(grid[2]) + 1)):
        if n1 == 0 and (n2 < 0 or (n2 == 0 and n3 < 0)):
            continue
        jumpidx = np.array([n1, n2, n3], dtype=np.float64)
        displacement = jumpidx @ cell
        jpositions = positions + displacement
        kpositions = positions - displacement
        disp1 = jpositions[:, None] - positions[None]
        disp2 = kpositions[:, None] - positions[None]
        dist1 = np.linalg.norm(disp1, axis=2)
        dist2 = np.linalg.norm(disp2, axis=2)
        if n1 == 0 and n2 == 0 and n3 == 0:
            mask1 = (dist1 < cutoff) * (dist1 > 1e-08)
            mask2 = (dist2 < cutoff) * (dist2 > 1e-08)
        else:
            mask1 = dist1 < cutoff
            mask2 = dist2 < cutoff
        iidx1, jidx1 = np.nonzero(mask1)
        iidx2, jidx2 = np.nonzero(mask2)
        iidxs.append(iidx1); jidxs.append(jidx1)
        isymb.append(symbols[iidx1]); jsymb.append(symbols[jidx1])
        disps.append(disp1[mask1]); dists.append(dist1[mask1])
        iidxs.append(iidx2); jidxs.append(jidx2)
        isymb.append(symbols[iidx2]); jsymb.append(symbols[jidx2])
        disps.append(disp2[mask2]); dists.append(dist2[mask2])
    return (np.concatenate(iidxs), np.concatenate(jidxs),
            np.concatenate(isymb), np.concatenate(jsymb),
            np.concatenate(disps), np.concatenate(dists))


def get_neighbors_info_np(symbols, positions, cells, crystalidx, pbcs, cutoff=RCUT):
    cryset = np.unique(crystalidx)
    totalidx = np.arange(len(symbols))
    iidx, jidx, isym, jsym, disp, dist = [], [], [], [], [], []
    for c, cid in enumerate(cryset):
        cmask = crystalidx == cid
        position = positions[cmask]
        symbol = symbols[cmask]
        crystali = totalidx[cmask]
        pbc, cell = pbcs[c], cells[c]
        idx, jdx, isy, jsy, dsp, dst = get_nn_np(symbol, position, cell, pbc, cutoff)
        iidx.append(crystali[idx]); jidx.append(crystali[jdx])
        isym.append(isy); jsym.append(jsy)
        disp.append(dsp); dist.append(dst)
    return (np.concatenate(iidx), np.concatenate(jidx),
            np.concatenate(isym), np.concatenate(jsym),
            np.concatenate(disp), np.concatenate(dist))


# ------------------------------- Pallas kernel ---------------------------------
def reann_kernel(starts_ref, nblk_ref, pair_ref, iidx_ref, sp_ref, w2_ref,
                 out_ref, acc_ref):
    """Grid: (atom tiles ["parallel"], pair blocks of this atom tile ["arbitrary"]).

    starts_ref / nblk_ref : SMEM int32 (n_atom_tiles,)  scalar-prefetch:
                            first pair-block index / number of pair blocks per atom tile.
    pair_ref : (8, T) f32       rows = [dist, angle_0..NO-1, valid, jsym, pad]
                                (pair axis = lane axis -> lane-dense VPU work)
    iidx_ref : (T, 128) int32   center-atom index RELATIVE to the atom-tile base,
                                replicated over 128 lanes on host (contiguous DMA).
    sp_ref   : (8, NS) f32      rows = [alpha_n (nmax), rs_n (nmax), csn_n (nmax), pad]
    w2_ref   : (NO*NO, NO*nmax) block-diagonal Wln, row index = o1*NO + o2
    out_ref  : (NO, ATILE) f32  rho transposed (atoms lane-dense)
    acc_ref  : (NO*nmax, ATILE) f32 scratch: transposed bnl accumulator
    """
    a = pl.program_id(0)
    p = pl.program_id(1)
    atile = out_ref.shape[1]

    @pl.when(p == 0)
    def _():
        acc_ref[...] = jnp.zeros_like(acc_ref)

    # Only pair blocks that belong to this atom tile contribute (host-sorted by
    # center atom); extra (padded-grid) steps are skipped entirely.
    @pl.when(p < nblk_ref[a])
    def _():
        pair = pair_ref[...]
        dist = pair[0:1, :]                       # (1, T)
        ang = pair[1:1 + NO, :]                   # (NO, T)  rows [1, dx, dy, dz]
        valid = pair[1 + NO:2 + NO, :]            # (1, T)
        jsymf = pair[2 + NO:3 + NO, :]            # (1, T)   neighbor species (exact ints)

        # cutoff: 0.25 * (cos(pi d / rcut) + 1)^2   (lane-dense over pairs)
        fcut = 0.25 * (jnp.cos(dist * jnp.float32(np.pi / RCUT)) + 1.0) ** 2

        # per-neighbor-species parameter selection via VPU selects (NS is tiny);
        # cj = Csn[jidx] = species_params[jsym] -> no per-atom gather needed.
        sp = sp_ref[...]
        alp = sp[0:NMAX, 0:1]                     # species 0 defaults
        rsn = sp[NMAX:2 * NMAX, 0:1]
        cjn = sp[2 * NMAX:3 * NMAX, 0:1]
        for s in range(1, NS):
            m = jsymf == jnp.float32(s)           # (1, T)
            alp = jnp.where(m, sp[0:NMAX, s:s + 1], alp)
            rsn = jnp.where(m, sp[NMAX:2 * NMAX, s:s + 1], rsn)
            cjn = jnp.where(m, sp[2 * NMAX:3 * NMAX, s:s + 1], cjn)

        # gaussian radial * cj * fcut; exponent masked by `valid` so padded pairs
        # are robustly zeroed (never inf * 0).
        expo = alp * (dist - rsn) ** 2 * valid
        r2 = jnp.exp(expo) * cjn * (fcut * valid)                     # (NMAX, T)

        # cjF row f = o*NMAX + n  ->  angle_o * r2_n                  (NO*NMAX, T)
        cjF = jnp.concatenate([ang[o:o + 1, :] * r2 for o in range(NO)], axis=0)

        # hi/lo bf16 split of cjF: the one-hot is exact in bf16, so two bf16 MXU
        # passes recover ~f32 accuracy at far less cost than a 3-pass f32 matmul.
        cj_hi = cjF.astype(jnp.bfloat16)
        cj_lo = (cjF - cj_hi.astype(jnp.float32)).astype(jnp.bfloat16)

        # scatter-add over center atoms: one-hot (pairs x 128-atom lane chunk) and
        # (NO*NMAX, T) @ (T, 128) matmuls whose output lanes (atoms) are dense.
        iidx_rel = iidx_ref[...]                                      # (T, 128) int32
        lane = lax.broadcasted_iota(jnp.int32, (1, 128), 1)
        for c in range(atile // 128):
            oh = (iidx_rel == (lane + c * 128)).astype(jnp.bfloat16)  # (T, 128)
            acc_ref[:, c * 128:(c + 1) * 128] += (
                jnp.dot(cj_hi, oh, preferred_element_type=jnp.float32)
                + jnp.dot(cj_lo, oh, preferred_element_type=jnp.float32))

    # finalize: fused block-diagonal Wln contraction + square + reduce over o1
    @pl.when(p == pl.num_programs(1) - 1)
    def _():
        t = jnp.dot(w2_ref[...], acc_ref[...],
                    preferred_element_type=jnp.float32)               # (NO*NO, ATILE)
        sq = t * t
        r = sq[0:NO, :]
        for o1 in range(1, NO):
            r = r + sq[o1 * NO:(o1 + 1) * NO, :]
        out_ref[...] = r                                              # rho^T, lane-dense


# ------------------------ host-side pair packing (sorted) ----------------------
def _pack_pairs(iidx, jsym, disp, dist, NTAp, atile, pair_tile):
    """Sort pairs by center atom, bucket them per atom tile, pad each bucket to a
    multiple of the pair tile, and emit lane-dense slabs + per-tile block ranges."""
    NN = len(dist)
    n_at = NTAp // atile

    order = np.argsort(np.asarray(iidx), kind="stable")
    iidx_s = np.asarray(iidx, dtype=np.int64)[order]
    jsym_s = np.asarray(jsym, dtype=np.int64)[order]
    dist_s = np.asarray(dist, dtype=np.float64)[order]
    disp_s = np.asarray(disp, dtype=np.float64).reshape(NN, 3)[order]

    tile_of = iidx_s // atile                                # atom tile of each pair
    counts = np.bincount(tile_of, minlength=n_at).astype(np.int64)
    cmax = max(1, int(counts.max()))
    tile = int(min(pair_tile, _round_up(cmax, 128)))         # pair-block length

    nblk = np.maximum(1, -(-counts // tile)).astype(np.int32)  # blocks per atom tile (>=1)
    starts = np.zeros(n_at, dtype=np.int32)                    # first block per atom tile
    if n_at > 1:
        starts[1:] = np.cumsum(nblk[:-1])
    NNp = int(nblk.sum()) * tile

    # destination slot of each sorted pair inside the padded slab
    seg = np.zeros(n_at + 1, dtype=np.int64)
    seg[1:] = np.cumsum(counts)
    dest = np.empty(NN, dtype=np.int64)
    for t in range(n_at):
        s0, s1 = int(seg[t]), int(seg[t + 1])
        dest[s0:s1] = int(starts[t]) * tile + np.arange(s1 - s0)

    pair_f = np.zeros((PAIR_ROWS, NNp), dtype=np.float32)
    angle = np.ones((NN, NO), dtype=np.float64)
    if LMAX > 1:
        angle[:, 1:4] = disp_s
    pair_f[0, dest] = dist_s
    pair_f[1:1 + NO, dest] = angle.T
    pair_f[1 + NO, dest] = 1.0                               # valid mask (padding -> 0)
    pair_f[2 + NO, dest] = jsym_s                            # neighbor species (exact in f32)

    # tile-relative center index, replicated to 128 lanes (padding -> -1, never matches)
    iidx_rep = np.full((NNp, 128), -1, dtype=np.int32)
    iidx_rep[dest, :] = (iidx_s - tile_of * atile).astype(np.int32)[:, None]

    return pair_f, iidx_rep, starts, nblk, tile


# --------------------------------- wrapper --------------------------------------
def reann_forward(symbols, positions, cells, crystalidx, pbcs, params,
                  pair_tile=2048, atom_tile=256):
    """pair_tile / atom_tile must be multiples of 128.  The per-step VMEM working set
    stays well inside the v7x 64 MiB budget at these defaults."""
    assert pair_tile % 128 == 0 and atom_tile % 128 == 0
    alpha, rs, species_params, orbital_params = params
    symbols = np.asarray(symbols)
    positions = np.asarray(positions, dtype=np.float64)
    cells = np.asarray(cells, dtype=np.float64)
    crystalidx = np.asarray(crystalidx)
    pbcs = np.asarray(pbcs, dtype=bool)

    iidx, jidx, _isym, jsym, disp, dist = get_neighbors_info_np(
        symbols, positions, cells, crystalidx, pbcs, RCUT)

    NTA = len(positions)

    # ---- atom-axis tiling (lane axis of accumulator / output) ----
    NTAp = _round_up(NTA, 128)
    atile = int(min(atom_tile, NTAp))
    if atile == NTAp and NTAp >= 256:
        # ensure >= 2 atom tiles so the "parallel" axis shards across v7x's 2 TCs
        atile = _round_up(NTAp // 2, 128)
    NTAp = _round_up(NTAp, atile)
    n_at = NTAp // atile

    # ---- host-sorted, per-atom-tile bucketed pair slabs ----
    pair_f, iidx_rep, starts, nblk, tile = _pack_pairs(
        iidx, jsym, disp, dist, NTAp, atile, pair_tile)
    max_nblk = int(nblk.max())

    # ---- small parameter slabs ----
    sp = np.zeros((_round_up(3 * NMAX, 8), NS), dtype=np.float32)
    sp[0:NMAX] = np.asarray(alpha, np.float64).T
    sp[NMAX:2 * NMAX] = np.asarray(rs, np.float64).T
    sp[2 * NMAX:3 * NMAX] = np.asarray(species_params, np.float64).T

    Wln = np.asarray(orbital_params, np.float64)[0][OIDX]             # (NO, nmax, NO)
    W2 = np.zeros((NO * NO, NO * NMAX), dtype=np.float32)             # block-diagonal
    for o1 in range(NO):
        W2[o1 * NO:(o1 + 1) * NO, o1 * NMAX:(o1 + 1) * NMAX] = Wln[o1].T

    # data-dependent pair-block index: this atom tile's blocks, clamped to its last
    # block when p overshoots (identical index -> Pallas skips the re-DMA).
    def pair_block(a, p, starts_ref, nblk_ref):
        blk = jnp.minimum(starts_ref[a] + p, starts_ref[a] + nblk_ref[a] - 1)
        return (0, blk)

    def iidx_block(a, p, starts_ref, nblk_ref):
        blk = jnp.minimum(starts_ref[a] + p, starts_ref[a] + nblk_ref[a] - 1)
        return (blk, 0)

    grid = (n_at, max_nblk)

    rho_t = pl.pallas_call(
        reann_kernel,
        out_shape=jax.ShapeDtypeStruct((NO, NTAp), jnp.float32),
        grid_spec=pltpu.PrefetchScalarGridSpec(
            num_scalar_prefetch=2,
            grid=grid,
            in_specs=[
                pl.BlockSpec((PAIR_ROWS, tile), pair_block),
                pl.BlockSpec((tile, 128), iidx_block),
                pl.BlockSpec(tuple(int(d) for d in sp.shape), lambda a, p, s, n: (0, 0)),
                pl.BlockSpec(tuple(int(d) for d in W2.shape), lambda a, p, s, n: (0, 0)),
            ],
            out_specs=pl.BlockSpec((NO, atile), lambda a, p, s, n: (0, a)),
            scratch_shapes=[pltpu.VMEM((NO * NMAX, atile), jnp.float32)],
        ),
        compiler_params=pltpu.CompilerParams(
            dimension_semantics=("parallel", "arbitrary"),
            vmem_limit_bytes=48 * 1024 * 1024,   # <= 48 MiB: headroom on v7x's 64 MiB
        ),
    )(jnp.asarray(starts, jnp.int32), jnp.asarray(nblk, jnp.int32),
      jnp.asarray(pair_f), jnp.asarray(iidx_rep), jnp.asarray(sp), jnp.asarray(W2))

    rho = jnp.transpose(rho_t)[:NTA, :]                # (NTA, NO)
    neigh = (iidx, jidx, jsym, disp, dist)
    return rho, neigh


# ------------------------ pure NumPy reference (for checking) -------------------
def reann_reference(symbols, neigh, params, NTA):
    alpha, rs, species_params, orbital_params = [np.asarray(p, np.float64) for p in params]
    iidx, jidx, jsym, disp, dist = neigh
    fcut = 0.25 * (np.cos(dist * np.pi / RCUT) + 1.0) ** 2
    radial = np.exp(alpha[jsym] * (dist[:, None] - rs[jsym]) ** 2)
    angle = np.ones((len(dist), NO))
    if LMAX > 1:
        angle[:, 1:4] = disp
    Fxyz = fcut[:, None, None] * angle[:, :, None] * radial[:, None, :]
    Csn = species_params[np.asarray(symbols)]
    cj = Csn[jidx]
    cjFxyz = cj[:, None, :] * Fxyz
    bnl = np.zeros((NTA, NO, NMAX))
    np.add.at(bnl, iidx, cjFxyz)
    Wln = orbital_params[0][OIDX]                            # (NO, nmax, NO)
    t = np.sum(Wln[None] * bnl[..., None], axis=2)           # (NTA, NO, NO)
    return np.sum(t ** 2, axis=1)                            # (NTA, NO)


# ------------------------------------ main ---------------------------------------
if __name__ == "__main__":
    key = jax.random.PRNGKey(0)
    k1, k2, k3, k4, k5, k6 = jax.random.split(key, 6)

    NTA = 160                                               # -> 2 atom tiles of 128

    # deterministic parameter init (same shapes as the PyTorch __init__)
    alpha = -(jax.random.uniform(k1, (NS, NMAX), jnp.float32) + 0.2)
    rs = jax.random.uniform(k2, (NS, NMAX), jnp.float32)
    species_params = jax.random.uniform(k3, (NS, NMAX), jnp.float32)
    orbital_base = jax.random.uniform(k4, (NMAX, NO), jnp.float32)
    orbital_params = jnp.tile(orbital_base[None, None], (LOOP, LMAX, 1, 1))
    params = (np.asarray(alpha), np.asarray(rs),
              np.asarray(species_params), np.asarray(orbital_params))

    # deterministic small "crystal": 1 cell, 160 atoms
    positions = np.asarray(jax.random.uniform(k5, (NTA, 3), jnp.float32)) * 12.0
    symbols = np.asarray(jax.random.randint(k6, (NTA,), 0, NS), dtype=np.int64)
    cells = np.eye(3, dtype=np.float64)[None] * 12.0          # (1,3,3)
    crystalidx = np.zeros(NTA, dtype=np.int64)
    pbcs = np.array([[True, False, False]], dtype=bool)       # (1,3)

    # small tiles so the demo exercises multi-atom-tile + multi-pair-block paths
    rho, neigh = reann_forward(symbols, positions, cells, crystalidx, pbcs,
                               params, pair_tile=512, atom_tile=128)
    rho = jax.block_until_ready(rho)

    rho_ref = reann_reference(symbols, neigh, params, NTA)
    np.testing.assert_allclose(np.asarray(rho, np.float64), rho_ref,
                               rtol=5e-4, atol=1e-3)
    print("KERNEL_OK")
</pallas_src>

<mosaic_0001>
module attributes {stable_mosaic.version = 11 : i64} {
  func.func @reann_kernel(%arg0: i32, %arg1: i32, %arg2: memref<2xi32, #tpu.memory_space<smem>>, %arg3: memref<2xi32, #tpu.memory_space<smem>>, %arg4: memref<8x512xf32, #tpu.memory_space<vmem>>, %arg5: memref<512x128xi32, #tpu.memory_space<vmem>>, %arg6: memref<8x2xf32, #tpu.memory_space<vmem>>, %arg7: memref<16x8xf32, #tpu.memory_space<vmem>>, %arg8: memref<4x128xf32, #tpu.memory_space<vmem>>, %arg9: memref<8x128xf32, #tpu.memory_space<vmem>>) attributes {dimension_semantics = [#tpu.dimension_semantics<parallel>, #tpu.dimension_semantics<arbitrary>], iteration_bounds = array<i64: 2, 26>, scalar_prefetch = 2 : i64, scratch_operands = 1 : i64, tpu.core_type = #tpu.core_type<tc>, window_params = [{transform_indices = @transform_0, window_bounds = array<i64: 8, 512>}, {transform_indices = @transform_1, window_bounds = array<i64: 512, 128>}, {pipeline_mode = #tpu.pipeline_mode<synchronous>, transform_indices = @transform_2, window_bounds = array<i64: 8, 2>}, {pipeline_mode = #tpu.pipeline_mode<synchronous>, transform_indices = @transform_3, window_bounds = array<i64: 16, 8>}, {transform_indices = @transform_4, window_bounds = array<i64: 4, 128>}]} {
    %c0_i32 = arith.constant 0 : i32
    %0 = arith.cmpi eq, %arg1, %c0_i32 : i32
    %1 = arith.extui %0 : i1 to i32
    %c0_i32_0 = arith.constant 0 : i32
    %2 = arith.cmpi ne, %1, %c0_i32_0 : i32
    scf.if %2 {
      %cst = arith.constant 0.000000e+00 : f32
      %11 = vector.broadcast %cst : f32 to vector<8x128xf32>
      %c0 = arith.constant 0 : index
      %c0_3 = arith.constant 0 : index
      %12 = vector.load %arg9[%c0, %c0_3] : memref<8x128xf32, #tpu.memory_space<vmem>>, vector<8x128xf32>
      tpu.vector_store %arg9[%c0, %c0_3], %11 {strides = array<i32>} : memref<8x128xf32, #tpu.memory_space<vmem>>, vector<8x128xf32>,
    } else {
    }
    %3 = arith.index_cast %arg0 : i32 to index
    %4 = memref.load %arg3[%3] : memref<2xi32, #tpu.memory_space<smem>>
    %5 = arith.cmpi slt, %arg1, %4 : i32
    %6 = arith.extui %5 : i1 to i32
    %c0_i32_1 = arith.constant 0 : i32
    %7 = arith.cmpi ne, %6, %c0_i32_1 : i32
    scf.if %7 {
      %c0 = arith.constant 0 : index
      %c0_3 = arith.constant 0 : index
      %11 = vector.load %arg4[%c0, %c0_3] : memref<8x512xf32, #tpu.memory_space<vmem>>, vector<8x512xf32>
      %12 = vector.extract_strided_slice %11 {offsets = [0, 0], sizes = [1, 512], strides = [1, 1]} : vector<8x512xf32> to vector<1x512xf32>
      %13 = vector.extract_strided_slice %11 {offsets = [1, 0], sizes = [4, 512], strides = [1, 1]} : vector<8x512xf32> to vector<4x512xf32>
      %14 = vector.extract_strided_slice %11 {offsets = [5, 0], sizes = [1, 512], strides = [1, 1]} : vector<8x512xf32> to vector<1x512xf32>
      %15 = vector.extract_strided_slice %11 {offsets = [6, 0], sizes = [1, 512], strides = [1, 1]} : vector<8x512xf32> to vector<1x512xf32>
      %cst = arith.constant 0.52359879 : f32
      %16 = vector.broadcast %cst : f32 to vector<1x512xf32>
      %17 = arith.mulf %12, %16 : vector<1x512xf32>
      %18 = math.cos %17 : vector<1x512xf32>
      %cst_4 = arith.constant 1.000000e+00 : f32
      %19 = vector.broadcast %cst_4 : f32 to vector<1x512xf32>
      %20 = arith.addf %18, %19 : vector<1x512xf32>
      %21 = arith.mulf %20, %20 : vector<1x512xf32>
      %cst_5 = arith.constant 2.500000e-01 : f32
      %22 = vector.broadcast %cst_5 : f32 to vector<1x512xf32>
      %23 = arith.mulf %22, %21 : vector<1x512xf32>
      %c0_6 = arith.constant 0 : index
      %c0_7 = arith.constant 0 : index
      %24 = vector.load %arg6[%c0_6, %c0_7] : memref<8x2xf32, #tpu.memory_space<vmem>>, vector<8x2xf32>
      %25 = vector.extract_strided_slice %24 {offsets = [0, 0], sizes = [2, 1], strides = [1, 1]} : vector<8x2xf32> to vector<2x1xf32>
      %26 = vector.extract_strided_slice %24 {offsets = [2, 0], sizes = [2, 1], strides = [1, 1]} : vector<8x2xf32> to vector<2x1xf32>
      %27 = vector.extract_strided_slice %24 {offsets = [4, 0], sizes = [2, 1], strides = [1, 1]} : vector<8x2xf32> to vector<2x1xf32>
      %cst_8 = arith.constant 1.000000e+00 : f32
      %28 = vector.broadcast %cst_8 : f32 to vector<1x512xf32>
      %29 = arith.cmpf oeq, %15, %28 : vector<1x512xf32>
      %30 = vector.extract_strided_slice %24 {offsets = [0, 1], sizes = [2, 1], strides = [1, 1]} : vector<8x2xf32> to vector<2x1xf32>
      %31 = vector.shape_cast %29 : vector<1x512xi1> to vector<1x512xi1>
      %32 = vector.broadcast %31 : vector<1x512xi1> to vector<2x512xi1>
      %33 = vector.shape_cast %30 : vector<2x1xf32> to vector<2x1xf32>
      %34 = vector.broadcast %33 : vector<2x1xf32> to vector<2x512xf32>
      %35 = vector.shape_cast %25 : vector<2x1xf32> to vector<2x1xf32>
      %36 = vector.broadcast %35 : vector<2x1xf32> to vector<2x512xf32>
      %37 = arith.select %32, %34, %36 : vector<2x512xi1>, vector<2x512xf32>
      %38 = vector.extract_strided_slice %24 {offsets = [2, 1], sizes = [2, 1], strides = [1, 1]} : vector<8x2xf32> to vector<2x1xf32>
      %39 = vector.shape_cast %29 : vector<1x512xi1> to vector<1x512xi1>
      %40 = vector.broadcast %39 : vector<1x512xi1> to vector<2x512xi1>
      %41 = vector.shape_cast %38 : vector<2x1xf32> to vector<2x1xf32>
      %42 = vector.broadcast %41 : vector<2x1xf32> to vector<2x512xf32>
      %43 = vector.shape_cast %26 : vector<2x1xf32> to vector<2x1xf32>
      %44 = vector.broadcast %43 : vector<2x1xf32> to vector<2x512xf32>
      %45 = arith.select %40, %42, %44 : vector<2x512xi1>, vector<2x512xf32>
      %46 = vector.extract_strided_slice %24 {offsets = [4, 1], sizes = [2, 1], strides = [1, 1]} : vector<8x2xf32> to vector<2x1xf32>
      %47 = vector.shape_cast %29 : vector<1x512xi1> to vector<1x512xi1>
      %48 = vector.broadcast %47 : vector<1x512xi1> to vector<2x512xi1>
      %49 = vector.shape_cast %46 : vector<2x1xf32> to vector<2x1xf32>
      %50 = vector.broadcast %49 : vector<2x1xf32> to vector<2x512xf32>
      %51 = vector.shape_cast %27 : vector<2x1xf32> to vector<2x1xf32>
      %52 = vector.broadcast %51 : vector<2x1xf32> to vector<2x512xf32>
      %53 = arith.select %48, %50, %52 : vector<2x512xi1>, vector<2x512xf32>
      %54 = vector.broadcast %12 : vector<1x512xf32> to vector<2x512xf32>
      %55 = arith.subf %54, %45 : vector<2x512xf32>
      %56 = arith.mulf %55, %55 : vector<2x512xf32>
      %57 = arith.mulf %37, %56 : vector<2x512xf32>
      %58 = vector.broadcast %14 : vector<1x512xf32> to vector<2x512xf32>
      %59 = arith.mulf %57, %58 : vector<2x512xf32>
      %60 = math.exp %59 : vector<2x512xf32>
      %61 = arith.mulf %60, %53 : vector<2x512xf32>
      %62 = arith.mulf %23, %14 : vector<1x512xf32>
      %63 = vector.broadcast %62 : vector<1x512xf32> to vector<2x512xf32>
      %64 = arith.mulf %61, %63 : vector<2x512xf32>
      %65 = vector.extract_strided_slice %13 {offsets = [0, 0], sizes = [1, 512], strides = [1, 1]} : vector<4x512xf32> to vector<1x512xf32>
      %66 = vector.broadcast %65 : vector<1x512xf32> to vector<2x512xf32>
      %67 = arith.mulf %66, %64 : vector<2x512xf32>
      %68 = vector.extract_strided_slice %13 {offsets = [1, 0], sizes = [1, 512], strides = [1, 1]} : vector<4x512xf32> to vector<1x512xf32>
      %69 = vector.broadcast %68 : vector<1x512xf32> to vector<2x512xf32>
      %70 = arith.mulf %69, %64 : vector<2x512xf32>
      %71 = vector.extract_strided_slice %13 {offsets = [2, 0], sizes = [1, 512], strides = [1, 1]} : vector<4x512xf32> to vector<1x512xf32>
      %72 = vector.broadcast %71 : vector<1x512xf32> to vector<2x512xf32>
      %73 = arith.mulf %72, %64 : vector<2x512xf32>
      %74 = vector.extract_strided_slice %13 {offsets = [3, 0], sizes = [1, 512], strides = [1, 1]} : vector<4x512xf32> to vector<1x512xf32>
      %75 = vector.broadcast %74 : vector<1x512xf32> to vector<2x512xf32>
      %76 = arith.mulf %75, %64 : vector<2x512xf32>
      %77 = tpu.concatenate %67, %70, %73, %76 in 0 : vector<2x512xf32>, vector<2x512xf32>, vector<2x512xf32>, vector<2x512xf32> -> vector<8x512xf32>
      %78 = arith.truncf %77 : vector<8x512xf32> to vector<8x512xbf16>
      %79 = arith.extf %78 : vector<8x512xbf16> to vector<8x512xf32>
      %80 = arith.subf %77, %79 : vector<8x512xf32>
      %81 = arith.truncf %80 : vector<8x512xf32> to vector<8x512xbf16>
      %c0_9 = arith.constant 0 : index
      %c0_10 = arith.constant 0 : index
      %82 = vector.load %arg5[%c0_9, %c0_10] : memref<512x128xi32, #tpu.memory_space<vmem>>, vector<512x128xi32>
      %83 = tpu.iota {dimensions = array<i32: 1>} : vector<1x128xi32>
      %c0_i32_11 = arith.constant 0 : i32
      %84 = vector.broadcast %c0_i32_11 : i32 to vector<1x128xi32>
      %85 = arith.addi %83, %84 : vector<1x128xi32>
      %86 = vector.broadcast %85 : vector<1x128xi32> to vector<512x128xi32>
      %87 = arith.cmpi eq, %82, %86 : vector<512x128xi32>
      %88 = arith.extui %87 : vector<512x128xi1> to vector<512x128xi32>
      %89 = arith.sitofp %88 : vector<512x128xi32> to vector<512x128xf32>
      %90 = arith.truncf %89 : vector<512x128xf32> to vector<512x128xbf16>
      %c0_12 = arith.constant 0 : index
      %c0_13 = arith.constant 0 : index
      %91 = vector.load %arg9[%c0_12, %c0_13] : memref<8x128xf32, #tpu.memory_space<vmem>>, vector<8x128xf32>
      %cst_14 = arith.constant dense<0.000000e+00> : vector<8x128xf32>
      %92 = tpu.matmul %78, %90, %cst_14 {dimension_numbers = #tpu.dot_dimension_numbers<[1], [0], [0], [1], [0, 0, 1, 1], [], []>} : vector<8x512xbf16>, vector<512x128xbf16>, vector<8x128xf32> -> vector<8x128xf32>
      %cst_15 = arith.constant dense<0.000000e+00> : vector<8x128xf32>
      %93 = tpu.matmul %81, %90, %cst_15 {dimension_numbers = #tpu.dot_dimension_numbers<[1], [0], [0], [1], [0, 0, 1, 1], [], []>} : vector<8x512xbf16>, vector<512x128xbf16>, vector<8x128xf32> -> vector<8x128xf32>
      %94 = arith.addf %92, %93 : vector<8x128xf32>
      %95 = arith.addf %91, %94 : vector<8x128xf32>
      %c0_16 = arith.constant 0 : index
      %c0_17 = arith.constant 0 : index
      %96 = vector.load %arg9[%c0_16, %c0_17] : memref<8x128xf32, #tpu.memory_space<vmem>>, vector<8x128xf32>
      tpu.vector_store %arg9[%c0_16, %c0_17], %95 {strides = array<i32>} : memref<8x128xf32, #tpu.memory_space<vmem>>, vector<8x128xf32>,
    } else {
    }
    %c25_i32 = arith.constant 25 : i32
    %8 = arith.cmpi eq, %arg1, %c25_i32 : i32
    %9 = arith.extui %8 : i1 to i32
    %c0_i32_2 = arith.constant 0 : i32
    %10 = arith.cmpi ne, %9, %c0_i32_2 : i32
    scf.if %10 {
      %c0 = arith.constant 0 : index
      %c0_3 = arith.constant 0 : index
      %11 = vector.load %arg7[%c0, %c0_3] : memref<16x8xf32, #tpu.memory_space<vmem>>, vector<16x8xf32>
      %c0_4 = arith.constant 0 : index
      %c0_5 = arith.constant 0 : index
      %12 = vector.load %arg9[%c0_4, %c0_5] : memref<8x128xf32, #tpu.memory_space<vmem>>, vector<8x128xf32>
      %cst = arith.constant dense<0.000000e+00> : vector<16x128xf32>
      %13 = tpu.matmul %11, %12, %cst {dimension_numbers = #tpu.dot_dimension_numbers<[1], [0], [0], [1], [0, 0, 1, 1], [], []>} : vector<16x8xf32>, vector<8x128xf32>, vector<16x128xf32> -> vector<16x128xf32>
      %14 = arith.mulf %13, %13 : vector<16x128xf32>
      %15 = vector.extract_strided_slice %14 {offsets = [0, 0], sizes = [4, 128], strides = [1, 1]} : vector<16x128xf32> to vector<4x128xf32>
      %16 = vector.extract_strided_slice %14 {offsets = [4, 0], sizes = [4, 128], strides = [1, 1]} : vector<16x128xf32> to vector<4x128xf32>
      %17 = arith.addf %15, %16 : vector<4x128xf32>
      %18 = vector.extract_strided_slice %14 {offsets = [8, 0], sizes = [4, 128], strides = [1, 1]} : vector<16x128xf32> to vector<4x128xf32>
      %19 = arith.addf %17, %18 : vector<4x128xf32>
      %20 = vector.extract_strided_slice %14 {offsets = [12, 0], sizes = [4, 128], strides = [1, 1]} : vector<16x128xf32> to vector<4x128xf32>
      %21 = arith.addf %19, %20 : vector<4x128xf32>
      %c0_6 = arith.constant 0 : index
      %c0_7 = arith.constant 0 : index
      %22 = vector.load %arg8[%c0_6, %c0_7] : memref<4x128xf32, #tpu.memory_space<vmem>>, vector<4x128xf32>
      tpu.vector_store %arg8[%c0_6, %c0_7], %21 {strides = array<i32>} : memref<4x128xf32, #tpu.memory_space<vmem>>, vector<4x128xf32>,
    } else {
    }
    return
  }
  func.func @transform_0(%arg0: i32, %arg1: i32, %arg2: memref<2xi32, #tpu.memory_space<smem>>, %arg3: memref<2xi32, #tpu.memory_space<smem>>) -> (i32, i32) {
    %0 = arith.index_cast %arg0 : i32 to index
    %1 = memref.load %arg2[%0] : memref<2xi32, #tpu.memory_space<smem>>
    %2 = arith.addi %1, %arg1 : i32
    %3 = arith.index_cast %arg0 : i32 to index
    %4 = memref.load %arg2[%3] : memref<2xi32, #tpu.memory_space<smem>>
    %5 = arith.index_cast %arg0 : i32 to index
    %6 = memref.load %arg3[%5] : memref<2xi32, #tpu.memory_space<smem>>
    %7 = arith.addi %4, %6 : i32
    %c1_i32 = arith.constant 1 : i32
    %8 = arith.subi %7, %c1_i32 : i32
    %9 = arith.minsi %2, %8 : i32
    %c0_i32 = arith.constant 0 : i32
    %c0_i32_0 = arith.constant 0 : i32
    return %c0_i32, %9 : i32, i32
  }
  func.func @transform_1(%arg0: i32, %arg1: i32, %arg2: memref<2xi32, #tpu.memory_space<smem>>, %arg3: memref<2xi32, #tpu.memory_space<smem>>) -> (i32, i32) {
    %0 = arith.index_cast %arg0 : i32 to index
    %1 = memref.load %arg2[%0] : memref<2xi32, #tpu.memory_space<smem>>
    %2 = arith.addi %1, %arg1 : i32
    %3 = arith.index_cast %arg0 : i32 to index
    %4 = memref.load %arg2[%3] : memref<2xi32, #tpu.memory_space<smem>>
    %5 = arith.index_cast %arg0 : i32 to index
    %6 = memref.load %arg3[%5] : memref<2xi32, #tpu.memory_space<smem>>
    %7 = arith.addi %4, %6 : i32
    %c1_i32 = arith.constant 1 : i32
    %8 = arith.subi %7, %c1_i32 : i32
    %9 = arith.minsi %2, %8 : i32
    %c0_i32 = arith.constant 0 : i32
    %c0_i32_0 = arith.constant 0 : i32
    return %9, %c0_i32 : i32, i32
  }
  func.func @transform_2(%arg0: i32, %arg1: i32, %arg2: memref<2xi32, #tpu.memory_space<smem>>, %arg3: memref<2xi32, #tpu.memory_space<smem>>) -> (i32, i32) {
    %c0_i32 = arith.constant 0 : i32
    %c0_i32_0 = arith.constant 0 : i32
    %c0_i32_1 = arith.constant 0 : i32
    return %c0_i32, %c0_i32_0 : i32, i32
  }
  func.func @transform_3(%arg0: i32, %arg1: i32, %arg2: memref<2xi32, #tpu.memory_space<smem>>, %arg3: memref<2xi32, #tpu.memory_space<smem>>) -> (i32, i32) {
    %c0_i32 = arith.constant 0 : i32
    %c0_i32_0 = arith.constant 0 : i32
    %c0_i32_1 = arith.constant 0 : i32
    return %c0_i32, %c0_i32_0 : i32, i32
  }
  func.func @transform_4(%arg0: i32, %arg1: i32, %arg2: memref<2xi32, #tpu.memory_space<smem>>, %arg3: memref<2xi32, #tpu.memory_space<smem>>) -> (i32, i32) {
    %c0_i32 = arith.constant 0 : i32
    %c0_i32_0 = arith.constant 0 : i32
    return %c0_i32, %arg0 : i32, i32
  }
}

</mosaic_0001>

<bundles_post_ra>
// kernel: tpu_custom_call.1
= control target key start
LH: loop header
LB: loop body
LE: loop exit
PB: predicated region body
PF: predicated region fallthrough
CT: control target
= control target key end

     0   :  { %s2429_s27 = smov [#allocation4]   ;;  %s2430_s28 = smov [#allocation5]   ;;  %s4122_s0 = inlined_call_operand.hbm [shape: s32[2], index: 0, kind: input, shape index: {}]   ;;  %s4123_s2 = inlined_call_operand.hbm [shape: f32[8,16896], index: 2, kind: input, shape index: {}]   ;;  %s4124_s3 = inlined_call_operand.hbm [shape: s32[16896,128], index: 3, kind: input, shape index: {}]   ;;  %s4125_s4 = inlined_call_operand.vmem [shape: f32[8,2], index: 4, kind: input, shape index: {}]   ;;  %s4126_s5 = inlined_call_operand.vmem [shape: f32[16,8], index: 5, kind: input, shape index: {}]   ;;  %s4127_s6 = inlined_call_operand.hbm [shape: f32[4,256], index: 6, kind: output, shape index: {}]   ;;  %s4128_s1 = inlined_call_operand.hbm [shape: s32[2], index: 1, kind: input, shape index: {}]  }
   0x1   :  { %4168 = sst [smem:[#allocation36_spill]] %s4123_s2  ;;  %s12_s23 = sshll.u32 %s4122_s0, 4  ;;  %s13_s23 = int_to_ptr.hbm [resolvable:$true] %s12_s23 }
   0x2   :  { %4169 = sst [smem:[#allocation37_spill]] %s4124_s3  ;;  %s17_s26 = sshll.u32 %s4128_s1, 4  ;;  %s18_s26 = int_to_ptr.hbm [resolvable:$true] %s17_s26 }
   0x3   :  { %4170 = sst [smem:[#allocation38_spill]] %s4125_s4 }
   0x4   :  { %4171 = sst [smem:[#allocation39_spill]] %s4126_s5 }
   0x5   :  { %4172 = sst [smem:[#allocation40_spill]] %s4127_s6 }
   0x6   :  { %15 = dma.hbm_to_smem %s13_s23, 16, %s2429_s27, [#allocation3] }
   0x7   :  { %20 = dma.hbm_to_smem %s18_s26, 16, %s2430_s28, [#allocation3] }
   0x8   :  { %2359 = dma.done.wait [#allocation3], 32 }
   0x9   :  { %2360 = vsyncadd [#allocation3], 4294967264 }
   0xa   :  { %23 = sfence }
   0xb   :  { %24 = vsyncpa [#allocation7], 0 }
   0xc   :  { %26 = vsyncpa [#allocation7 + $0x1], 0 }
   0xd   :  { %27 = vsyncpa [#allocation10], 0 }
   0xe   :  { %29 = vsyncpa [#allocation10 + $0x1], 0 }
   0xf   :  { %30 = vsyncpa [#allocation8], 0 }
  0x10   :  { %32 = vsyncpa [#allocation8 + $0x1], 0  ;;  %s2484_s0 = smov 0   ;;  %s2486_s29 = smov 0  }
  0x11   :  { %s2488_s1 = smov 0   ;;  %s2490_s30 = smov 0  }
  0x12   :  { %s2492_s7 = smov 0   ;;  %s2494_s8 = smov 0  }
  0x13   :  { %s2496_s9 = smov 0   ;;  %s2498_s10 = smov 0  }
  0x14   :  { %s2500_s11 = smov 0   ;;  %s2502_s12 = smov 0  }
  0x15   :  { %s2504_s13 = smov 0   ;;  %s2506_s14 = smov 0  }
  0x16   :  { %s2508_s15 = smov 0   ;;  %s2510_s16 = smov 0  }
  0x17 LB: > { %4173 = sst [smem:[#allocation24_spill]] %s2395_s8  ;;  %s47_s17 = sadd.s32 1, %s2419_s14  ;;  %s2427_s16 = sphi %s2510_s16, %s38_s16   ;;  %s2423_s15 = sphi %s2508_s15, %s4365_s15   ;;  %s2419_s14 = sphi %s2506_s14, %s4373_s14   ;;  %s2415_s13 = sphi %s2504_s13, %s4363_s13   ;;  %s2411_s12 = sphi %s2502_s12, %s4372_s12   ;;  %s2407_s11 = sphi %s2500_s11, %s4362_s11   ;;  %s2403_s10 = sphi %s2498_s10, %s4371_s10   ;;  %s2399_s9 = sphi %s2496_s9, %s4360_s9   ;;  %s2395_s8 = sphi %s2494_s8, %s4359_s8   ;;  %s2391_s7 = sphi %s2492_s7, %s4370_s7   ;;  %s2387_s30 = sphi %s2490_s30, %s4369_s30   ;;  %s2383_s1 = sphi %s2488_s1, %s4368_s1   ;;  %s2379_s29 = sphi %s2486_s29, %s4367_s29   ;;  %s2375_s0 = sphi %s2484_s0, %s4366_s0  }
  0x18   : > { %4174 = sst [smem:[#allocation25_spill]] %s2403_s10  ;;  %s50_s18 = sadd.s32 1, %s2423_s15 }
  0x19   : > { %4175 = sst [smem:[#allocation26_spill]] %s2407_s11  ;;  %p48_p0 = scmp.ge.s32.totalorder %s47_s17, 26 }
  0x1a   : > { %4176 = sst [smem:[#allocation27_spill]] %s2411_s12  ;;  %s4129_s20 = sadd.s32 4294967295, %s2427_s16  }
  0x1b   : > { %4177 = sst [smem:[#allocation28_spill]] %s2415_s13  ;;  %s4375_s17 = smov (%p48_p0, %s47_s17), 0 }
  0x1c   : > { %4178 = sst [smem:[#allocation29_spill]] %s2423_s15  ;;  %s4377_s18 = smov (!%p48_p0, %s50_s18), %s2423_s15 }
  0x1d   : > { %s54_s19 = sld [smem:[#allocation4 + %s2423_s15]]  ;;  %p78_p1 = scmp.ne.s32.totalorder %s2407_s11, %s2403_s10 }
  0x1e   : > { %s56_s21 = sld [smem:[#allocation5 + %s2423_s15]]  ;;  %p52_p2 = scmp.ge.s32.totalorder %s4377_s18, 2 }
  0x1f   : > { %4179 = sst [smem:[#allocation30_spill]] %s4375_s17  ;;  %p79_p3 = scmp.eq.s32.totalorder %s2427_s16, 0 }
  0x20   : > { %p84_p4 = scmp.ne.s32.totalorder %s2403_s10, %s2399_s9  ;;  %s4379_s18 = smov (%p52_p2, %s4377_s18), 0 }
  0x21   : > { %4180 = sst [smem:[#allocation31_spill]] %s4379_s18  ;;  %p2570_p5 = scmp.eq.s32.totalorder %s4129_s20, 0 }
  0x22   : > { %s61_s27 = sld [smem:[#allocation4 + %s4379_s18]]  ;;  %p2590_p8 = por %p79_p3, %p78_p1 }
  0x23   : > { %s55_s23 = sadd.s32 %s2419_s14, %s54_s19  ;;  %s63_s28 = sld [smem:[#allocation5 + %s4379_s18]] }
  0x24   : > { %s57_s24 = sadd.s32 %s56_s21, %s54_s19  ;;  %p2578_p7 = por %p2570_p5, %p84_p4 }
  0x25   : > { %s1782_s26 = sadd.s32 4294967295, %s57_s24  ;;  %s94_s19 = sld [smem:[#allocation4 + %s2423_s15]] }
  0x26   : > { %p59_p6 = scmp.lt.s32.totalorder %s55_s23, %s1782_s26  ;;  %s71_s21 = sadd.s32 1, %s2407_s11 }
  0x27   : > { %s4182_s9 = scalar_select %p2578_p7, 1, 0 }
  0x28   : > { %s4381_s23 = smov (!%p59_p6, %s55_s23), %s1782_s26  ;;  %s96_s22 = sld [smem:[#allocation5 + %s2423_s15]] }
  0x29   : > { %4183 = sst [smem:[#allocation32_spill]] %s4182_s9  ;;  %s62_s6 = sadd.s32 %s61_s27, %s4375_s17 }
  0x2a   : > { %s101_s20 = sld [smem:[#allocation4 + %s4379_s18]]  ;;  %s64_s4 = sadd.s32 %s63_s28, %s61_s27 }
  0x2b   : > { %s103_s5 = sld [smem:[#allocation5 + %s4379_s18]]  ;;  %s111_s13 = sadd.s32 1, %s2395_s8 }
  0x2c   : > { %s1783_s12 = sadd.s32 4294967295, %s64_s4  ;;  %s95_s26 = sadd.s32 %s2419_s14, %s94_s19 }
  0x2d   : > { %p66_p9 = scmp.lt.s32.totalorder %s62_s6, %s1783_s12  ;;  %p124_p10 = scmp.ne.s32.totalorder %s2391_s7, %s2387_s30 }
  0x2e   : > { %s97_s9 = sadd.s32 %s96_s22, %s94_s19  ;;  %s176_s10 = ssub.s32 %s2423_s15, %s4379_s18 }
  0x2f   : > { %s4383_s6 = smov (!%p66_p9, %s62_s6), %s1783_s12  ;;  %s1784_s3 = sadd.s32 4294967295, %s97_s9 }
  0x30   : > { %s102_s2 = sadd.s32 %s101_s20, %s4375_s17  ;;  %s68_s27 = ssub.s32 %s4381_s23, %s4383_s6 }
  0x31   : > { %p99_p11 = scmp.lt.s32.totalorder %s95_s26, %s1784_s3  ;;  %p69_p12 = scmp.eq.s32.totalorder %s68_s27, 0 }
  0x32   : > { %s104_s4 = sadd.s32 %s103_s5, %s101_s20  ;;  %p2612_p13 = por %p124_p10, %p2570_p5 }
  0x33   : > { %s4385_s26 = smov (!%p99_p11, %s95_s26), %s1784_s3  ;;  %s1785_s22 = sadd.s32 4294967295, %s104_s4 }
  0x34   : > { %s2605_s28 = scalar_select %p69_p12, %s2407_s11, %s71_s21  }
  0x35   : > { %p106_p0 = scmp.lt.s32.totalorder %s102_s2, %s1785_s22  ;;  %p177_p1 = scmp.eq.s32.totalorder %s176_s10, 0 }
  0x36   : > { %4185 = sst [smem:[#allocation33_spill]] %s2605_s28  ;;  %s179_s3 = sadd.s32 1, %s2383_s1 }
  0x37   : > { %p189_p2 = scmp.ne.s32.totalorder %s2383_s1, %s2379_s29  ;;  %s4387_s2 = smov (!%p106_p0, %s102_s2), %s1785_s22 }
  0x38   : > { %s2620_s5 = scalar_select %p177_p1, %s2383_s1, %s179_s3  }
  0x39   : > { %s108_s6 = ssub.s32 %s4385_s26, %s4387_s2  ;;  %s4188_s30 = sadd.s32 4294967295, %s2427_s16  }
  0x3a   : > { %4187 = sst [smem:[#allocation34_spill]] %s2620_s5  ;;  %p190_p4 = scmp.eq.s32.totalorder %s4188_s30, 51 }
  0x3b   : > { %p109_p5 = scmp.eq.s32.totalorder %s108_s6, 0  ;;  %p195_p6 = scmp.ne.s32.totalorder %s2379_s29, %s2375_s0 }
  0x3c   : > { %p2626_p9 = por %p190_p4, %p189_p2  ;;  %s4190_s20 = sadd.s32 4294967294, %s2427_s16  }
  0x3d   : > { %p196_p10 = scmp.eq.s32.totalorder %s4190_s20, 51  ;;  %p4140_p12 = scmp.lt.s32.totalorder %s2427_s16, 52 }
  0x3e   : > { %s2635_s23 = scalar_select %p109_p5, %s2395_s8, %s111_s13  }
  0x3f   : > { %p2637_p11 = por %p196_p10, %p195_p6  ;;  %p118_p0 = scmp.ne.s32.totalorder %s2395_s8, %s2391_s7 }
  0x40   : > { %4191 = sst [smem:[#allocation35_spill]] %s2635_s23  ;;  %s4137_s25 = sand.u32 1, %s2407_s11  }
  0x41   : > { %s4192_s2 = scalar_select %p2637_p11, 1, 0 }
  0x42   : > { %p2649_p1 = pnand %p4140_p12, %p2590_p8  ;;  %s1788_s27 = sshll.u32 %s4137_s25, 5 }
  0x43   : > { %s2016_s19 = scalar_select %p2590_p8, [#allocation4], [#allocation12] }
  0x44   : > { %s2017_s13 = scalar_select %p2590_p8, %s2423_s15, 0 }
  0x45   : > { %s4389_s19 = smov (!%p4140_p12, %s2016_s19), [#allocation16]  ;;  %p2670_p2 = por %p118_p0, %p79_p3 }
  0x46   : > { %s4391_s13 = smov (!%p4140_p12, %s2017_s13), 0  ;;  %s226_s25 = scalar_lea.vmem [#allocation6], %s1788_s27 }
  0x47   : > { %s2018_s21 = scalar_select %p2590_p8, [#allocation5], [#allocation13] }
  0x48   : > { %s227_s26 = sld [smem:[%s4389_s19 + %s4391_s13]]  ;;  %p2679_p8 = pnand %p4140_p12, %p2670_p2 }
  0x49   : > { %s4393_s21 = smov (!%p4140_p12, %s2018_s21), [#allocation17]  ;;  %s242_s18 = sshll.u32 %s226_s25, 4  ;;  %s243_s18 = int_to_ptr.vmem [resolvable:$true] %s242_s18 }
  0x4a   : > { %s229_s22 = sld [smem:[%s4393_s21 + %s4391_s13]]  ;;  %p2219_p10 = pneg %p2649_p1 }
  0x4b   : > { %s2021_s6 = scalar_select %p2670_p2, [#allocation4], [#allocation14] }
  0x4c   : > { %s2022_s30 = scalar_select %p2670_p2, %s2423_s15, 0 }
  0x4d   : > { %s4395_s6 = smov (!%p4140_p12, %s2021_s6), [#allocation18]  ;;  %s4196_s28 = sld [smem:[#allocation36_spill]] }
  0x4e   : > { %s228_s3 = sadd.s32 %s2419_s14, %s227_s26  ;;  %s4399_s30 = smov (!%p4140_p12, %s2022_s30), 0 }
  0x50   : > { %s230_s20 = sadd.s32 %s229_s22, %s227_s26  ;;  %s4197_s26 = sand.u32 1, %s2407_s11  }
  0x51   : > { %s1789_s19 = sadd.s32 4294967295, %s230_s20  ;;  %s223_s22 = scalar_lea.sflag [#allocation7], %s4197_s26 }
  0x52   : > { %p232_p3 = scmp.lt.s32.totalorder %s228_s3, %s1789_s19 }
  0x53   : > { %s2222_s17 = scalar_lea.hbm %s4196_s28, 1056 }
  0x54   : > { %s4397_s3 = smov (!%p232_p3, %s228_s3), %s1789_s19 }
  0x55   : > { %s2013_s13 = sshll.u32 %s4397_s3, 5 }
  0x56   : > { %s238_s23 = scalar_lea.hbm %s4196_s28, %s2013_s13 }
  0x57   : > { %s240_s5 = sshll.u32 %s238_s23, 4  ;;  %s241_s5 = int_to_ptr.hbm [resolvable:$true] %s240_s5 }
  0x58   : > { %s2215_s27 = sshra.s32 %s241_s5, 4  ;;  %s2216_s27 = int_to_ptr.hbm [resolvable:$true] %s2215_s27 }
  0x59   : > { %s2217_s25 = scalar_lea.hbm %s2216_s27, 32  ;;  %p2223_p12 = scmp.lt.s32.totalorder %s2216_s27, %s4196_s28 }
  0x5a   : > { %p2218_p6 = scmp.ne.s32.totalorder %s2216_s27, %s2217_s25  ;;  %p2224_p4 = scmp.lt.s32.totalorder %s2222_s17, %s2217_s25 }
  0x5c   : > { %p2220_p0 = pnand %p2219_p10, %p2218_p6  ;;  %p2225_p5 = por %p2224_p4, %p2223_p12 }
  0x5e   : > { %p2221_p3 = pneg %p2220_p0 }
  0x60   : > { %p2226_p11 = pnand %p2225_p5, %p2221_p3 }
  0x62   : > { %2229 = shalt.err (!%p2226_p11)
}
  0x63   : > { %2037 = dma.hbm_to_vmem [thread:$0]  (!%p2649_p1), %s241_s5, 512, %s243_s18, %s223_s22  }
  0x64   : > { %s2023_s23 = scalar_select %p2670_p2, [#allocation5], [#allocation15] }
  0x65   : > { %p4198_p6 = scmp.lt.s32.totalorder %s2427_s16, 53  ;;  %p4199_p10 = scmp.ge.s32.totalorder %s2427_s16, 1 }
  0x66   : > { %s254_s26 = sld [smem:[%s4395_s6 + %s4399_s30]]  ;;  %p4201_p12 = scmp.lt.s32.totalorder %s2427_s16, 52 }
  0x67   : > { %p2715_p0 = pnand %p4199_p10, %p4198_p6  ;;  %s249_s27 = sand.u32 1, %s2395_s8  }
  0x68   : > { %s4401_s23 = smov (!%p4201_p12, %s2023_s23), [#allocation19]  ;;  %s1792_s25 = sshll.u32 %s249_s27, 9 }
  0x69   : > { %s256_s9 = sld [smem:[%s4401_s23 + %s4399_s30]]  ;;  %s253_s18 = scalar_lea.vmem [#allocation9], %s1792_s25 }
  0x6a   : > { %s268_s5 = sshll.u32 %s253_s18, 4  ;;  %s4202_s13 = sld [smem:[#allocation37_spill]]  ;;  %s269_s5 = int_to_ptr.vmem [resolvable:$true] %s268_s5 }
  0x6b   : > { %s250_s11 = scalar_lea.sflag [#allocation10], %s249_s27  ;;  %p2249_p2 = pneg %p2679_p8 }
  0x6c   : > { %s255_s3 = sadd.s32 %s2419_s14, %s254_s26 }
  0x6f   : > { %s257_s20 = sadd.s32 %s256_s9, %s254_s26 }
  0x70   : > { %s1793_s17 = sadd.s32 4294967295, %s257_s20  ;;  %s4203_s28 = smov %s4202_s13 }
  0x71   : > { %p259_p11 = scmp.lt.s32.totalorder %s255_s3, %s1793_s17  ;;  %s2252_s9 = scalar_lea.hbm %s4203_s28, 16896 }
  0x73   : > { %s4403_s3 = smov (!%p259_p11, %s255_s3), %s1793_s17 }
  0x74   : > { %s2014_s4 = sshll.u32 %s4403_s3, 9 }
  0x75   : > { %s265_s15 = scalar_lea.hbm %s4202_s13, %s2014_s4 }
  0x76   : > { %s266_s6 = sshll.u32 %s265_s15, 4  ;;  %s267_s6 = int_to_ptr.hbm [resolvable:$true] %s266_s6 }
  0x77   : > { %s2245_s8 = sshra.s32 %s267_s6, 4  ;;  %s2246_s8 = int_to_ptr.hbm [resolvable:$true] %s2245_s8 }
  0x78   : > { %s2247_s30 = scalar_lea.hbm %s2246_s8, 512  ;;  %p2253_p3 = scmp.lt.s32.totalorder %s2246_s8, %s4203_s28 }
  0x79   : > { %p2248_p1 = scmp.ne.s32.totalorder %s2246_s8, %s2247_s30  ;;  %p2254_p6 = scmp.lt.s32.totalorder %s2252_s9, %s2247_s30 }
  0x7b   : > { %p2250_p4 = pnand %p2249_p2, %p2248_p1  ;;  %p2255_p10 = por %p2254_p6, %p2253_p3 }
  0x7d   : > { %p2251_p5 = pneg %p2250_p4 }
  0x7f   : > { %p2256_p12 = pnand %p2255_p10, %p2251_p5 }
  0x81   : > { %2259 = shalt.err (!%p2256_p12)
}
  0x82   : > { %s2431_s15 = smov 128   ;;  %s2432_s27 = smov 8  }
  0x83   : > { %2044 = dma.hbm_to_vmem [thread:$0]  (!%p2679_p8), %s267_s6, 8192, %s269_s5, %s250_s11, %s2431_s15, %s2431_s15, %s2432_s27  }
  0x84   : > { %280 = sbr.rel (%p2715_p0) target bundleno = 742 (0x2e6), region = 36  ;;  %s4204_s20 = sld [smem:[#allocation25_spill]] (!%p2715_p0) }
  0x8a   : > { %s282_s18 = sand.u32 1, %s4204_s20  }
  0x8b   : > { %s1797_s4 = sshll.u32 %s282_s18, 5  ;;  %s283_s22 = scalar_lea.sflag [#allocation7], %s282_s18 }
  0x8c   : > { %s2739_s19 = scalar_lea.vmem [#allocation6], %s1797_s4 }
  0x8d   : > { %2362 = dma.done.wait (%p2578_p7), %s283_s22, 512  }
  0x8e   : > { %2364 = vsyncadd (%p2578_p7), %s283_s22, 4294966784  ;;  %s292_s8 = sand.u32 1, %s2391_s7  }
  0x8f   : > { %s1798_s24 = sshll.u32 %s292_s8, 9  ;;  %s293_s11 = scalar_lea.sflag [#allocation10], %s292_s8 }
  0x90   : > { %s2746_s5 = scalar_lea.vmem [#allocation9], %s1798_s24 }
  0x91   : > { %2366 = dma.done.wait (%p2612_p13), %s293_s11, 8192  }
  0x92   : > { %2368 = vsyncadd (%p2612_p13), %s293_s11, 4294959104  ;;  %s324_s21 = sand.u32 1, %s2379_s29   ;;  %s4206_s30 = sld [smem:[#allocation27_spill]] }
  0x93   : > { %s2755_s13 = sshll.u32 %s324_s21, 2 }
  0x94   : > { %s326_s6 = scalar_lea.vmem [#allocation11], %s2755_s13 }
  0x98   : > { %p1800_p7 = scmp.ne.s32.totalorder %s4206_s30, 0 }
  0x9a   : > { %346 = sbr.rel (%p1800_p7) target bundleno = 161 (0xa1), region = 48 }
  0x9f   : > { %v2433_v0 = vmov 0.0  }
  0xa0   : > { %347 = vst [vmem:[#allocation2] sm:$0xff] %v2433_v0 }
  0xa1 PF: > { %s4207_s23 = sld [smem:[#allocation28_spill]] }
  0xa2   : > { %s4208_s9 = sld [smem:[#allocation27_spill]] }
  0xa7   : > { %s348_s26 = sld [smem:[#allocation5 + %s4207_s23]] }
  0xad   : > { %p1801_p8 = scmp.ge.s32.totalorder %s4208_s9, %s348_s26 }
  0xae   : > { %s4209_s3 = sld [smem:[#allocation38_spill]] (!%p1801_p8) }
  0xaf   : > { %352 = sbr.rel (%p1801_p8) target bundleno = 569 (0x239), region = 52 }
  0xb4   : > { %v989_v1 = vld [vmem:[%s4209_s3] sm:$0xff]  ;;  %v2434_v2 = vmov 1   ;;  %v353_v3 = vld [vmem:[%s2739_s19] sm:$0xff]  ;;  %v354_v4 = vld [vmem:[%s2739_s19 + $0x8] sm:$0xff]  ;;  %v2435_v7 = vmov 0  }
  0xb5   : > { %2177 = vset.pattern.permute.xlu0 %v2434_v2  ;;  %v2766_v5 = vmul.f32 0.5235988, %v353_v3  ;;  %v2768_v6 = vmul.f32 0.5235988, %v354_v4  ;;  %v355_v16 = vld [vmem:[%s2739_s19 + $0x10] sm:$0xff] }
  0xb6   : > { %1008 = vperm.xlu0 %2177, %v989_v1   ;;  %v2776_v21 = vmul.f32 0.5235988, %v355_v16  ;;  %v2436_v25 = vmov 2102212464   ;;  %v2437_v29 = vmov 683565275  }
  0xb7   : > { %v364_v8 = vand.u32 2139095040, %v2766_v5  ;;  %v518_v9 = vand.u32 2139095040, %v2768_v6  ;;  %v361_v24 = vand.u32 2147483647, %v2766_v5  ;;  %v2438_v31 = vmov 2475754826  }
  0xb8   : > { %v2439_v34 = vmov 2131351028   ;;  %v2440_v40 = vmov 920167782   ;;  %v2441_v46 = vmov 1326507024  }
  0xb9   : > { %v365_v10 = vshrl.u32 %v364_v8, 23  ;;  %v519_v11 = vshrl.u32 %v518_v9, 23  ;;  %v368_v27 = vand.u32 8388607, %v361_v24  ;;  %v672_v48 = vand.u32 2139095040, %v2776_v21 }
  0xba   : > { %v515_v54 = vand.u32 2147483647, %v2768_v6 }
  0xbb   : > { %v1802_v12 = vadd.s32 4294967169, %v365_v10  ;;  %v1805_v13 = vadd.s32 4294967169, %v519_v11  ;;  %v369_v38 = vor.u32 8388608, %v368_v27  ;;  %v2852_v8 = vshrl.u32 %v672_v48, 23 }
  0xbc   : > { %v2842_v62 = vand.u32 8388607, %v515_v54 }
  0xbd   : > { %v371_v14 = vadd.s32 1, %v1802_v12  ;;  %v525_v15 = vadd.s32 1, %v1805_v13  ;;  %v2818_v50 = vshll.u32 %v369_v38, 8 }
  0xbe   : > { %2178 = vset.pattern.permute.xlu0 %v2435_v7 }
  0xbf   : > { %1012 = vperm.xlu0 %2178, %v989_v1   ;;  %vm372_vm0 = vcmp.gt.s32.totalorder %v371_v14, 0  ;;  %vm526_vm1 = vcmp.gt.s32.totalorder %v525_v15, 0  ;;  %v410_v56 = vand.u32 65535, %v2818_v50  ;;  %v411_v61 = vshrl.u32 %v2818_v50, 16 }
  0xc0   : > { %v373_v17 = vsel %vm372_vm0, %v371_v14, 0  ;;  %v527_v18 = vsel %vm526_vm1, %v525_v15, 0  ;;  %v523_v15 = vor.u32 8388608, %v2842_v62 }
  0xc1   : > { %v375_v19 = vand.u32 31, %v373_v17  ;;  %v2774_v20 = vand.u32 31, %v527_v18  ;;  %v2787_v28 = vshrl.u32 %v373_v17, 5  ;;  %v2854_v12 = vshrl.u32 %v527_v18, 5 }
  0xc3   : > { %v2778_v22 = vsub.s32 32, %v375_v19  ;;  %v2781_v23 = vsub.s32 32, %v2774_v20  ;;  %v387_v26 = vshll.u32 %v2436_v25, %v375_v19  ;;  %v378_v30 = vshll.u32 %v2437_v29, %v375_v19 }
  0xc4   : > { %v381_v33 = vshll.u32 %v2438_v31, %v375_v19  ;;  %v384_v36 = vshll.u32 %v2439_v34, %v375_v19  ;;  %v390_v42 = vshll.u32 %v2440_v40, %v375_v19  ;;  %vm393_vm2 = vcmp.lt.s32.totalorder %v2787_v28, 1 }
  0xc5   : > { %v379_v32 = vshrl.u32 %v2438_v31, %v2778_v22  ;;  %v382_v35 = vshrl.u32 %v2439_v34, %v2778_v22  ;;  %v385_v37 = vshrl.u32 %v2436_v25, %v2778_v22  ;;  %v388_v41 = vshrl.u32 %v2440_v40, %v2778_v22 }
  0xc6   : > { %v391_v47 = vshrl.u32 %v2441_v46, %v2778_v22  ;;  %vm395_vm3 = vcmp.lt.s32.totalorder %v2787_v28, 3  ;;  %vm394_vm4 = vcmp.lt.s32.totalorder %v2787_v28, 2  ;;  %vm396_vm5 = vcmp.lt.s32.totalorder %v2787_v28, 4 }
  0xc7   : > { %v2798_v39 = vor.u32 %v379_v32, %v378_v30  ;;  %v2803_v43 = vor.u32 %v382_v35, %v381_v33  ;;  %v2805_v44 = vor.u32 %v385_v37, %v384_v36  ;;  %v389_v45 = vor.u32 %v388_v41, %v387_v26 }
  0xc8   : > { %v392_v51 = vor.u32 %v391_v47, %v390_v42  ;;  %v532_v57 = vshll.u32 %v2437_v29, %v2774_v20  ;;  %v533_v58 = vshrl.u32 %v2438_v31, %v2781_v23  ;;  %v535_v3 = vshll.u32 %v2438_v31, %v2774_v20 }
  0xc9   : > { %v401_v49 = vsel %vm393_vm2, %v2798_v39, %v2803_v43  ;;  %v402_v52 = vsel %vm396_vm5, %v389_v45, 920167782  ;;  %v405_v53 = vsel %vm393_vm2, %v2803_v43, %v2805_v44  ;;  %v536_v4 = vshrl.u32 %v2439_v34, %v2781_v23 }
  0xca   : > { %v403_v55 = vsel %vm395_vm3, %v2805_v44, %v402_v52  ;;  %v406_v60 = vsel %vm396_vm5, %v392_v51, 1326507024  ;;  %v2857_v16 = vor.u32 %v533_v58, %v532_v57  ;;  %v538_v35 = vshll.u32 %v2439_v34, %v2774_v20 }
  0xcb   : > { %v404_v59 = vsel %vm394_vm4, %v401_v49, %v403_v55  ;;  %v407_v63 = vsel %vm395_vm3, %v389_v45, %v406_v60  ;;  %v2859_v33 = vor.u32 %v536_v4, %v535_v3  ;;  %v539_v38 = vshrl.u32 %v2436_v25, %v2781_v23 }
  0xcc   : > { %v434_v0 = vand.u32 65535, %v404_v59  ;;  %v435_v1 = vshrl.u32 %v404_v59, 16  ;;  %v408_v2 = vsel %vm394_vm4, %v405_v53, %v407_v63  ;;  %v541_v42 = vshll.u32 %v2436_v25, %v2774_v20 }
  0xcd   : > { %v412_v9 = vand.u32 65535, %v408_v2  ;;  %v413_v10 = vshrl.u32 %v408_v2, 16  ;;  %v542_v45 = vshrl.u32 %v2440_v40, %v2781_v23  ;;  %v544_v49 = vshll.u32 %v2440_v40, %v2774_v20 }
  0xce   : > { %v437_v11 = vmul.u32 %v435_v1, %v410_v56  ;;  %v436_v13 = vmul.u32 %v434_v0, %v410_v56  ;;  %v438_v14 = vmul.u32 %v434_v0, %v411_v61  ;;  %v439_v27 = vmul.u32 %v435_v1, %v411_v61 }
  0xcf   : > { %v414_v17 = vmul.u32 %v412_v9, %v410_v56  ;;  %v415_v19 = vmul.u32 %v413_v10, %v410_v56  ;;  %v416_v26 = vmul.u32 %v412_v9, %v411_v61  ;;  %v417_v36 = vmul.u32 %v413_v10, %v411_v61 }
  0xd0   : > { %v440_v30 = vshll.u32 %v437_v11, 16  ;;  %v442_v32 = vshll.u32 %v438_v14, 16  ;;  %v441_v52 = vshrl.u32 %v437_v11, 16  ;;  %v377_v55 = vshrl.u32 %v2437_v29, %v2778_v22 }
  0xd1   : > { %v418_v18 = vshll.u32 %v415_v19, 16  ;;  %v420_v37 = vshll.u32 %v416_v26, 16  ;;  %v419_v56 = vshrl.u32 %v415_v19, 16  ;;  %v398_v58 = vsel %vm396_vm5, %v2805_v44, 2102212464 }
  0xd2   : > { %vm444_vm6 = vc.u32 %v436_v13, %v440_v30  ;;  %v446_v41 = vadd.s32 %v440_v30, %v436_v13  ;;  %v540_v20 = vor.u32 %v539_v38, %v538_v35  ;;  %v397_v61 = vsel %vm393_vm2, %v377_v55, %v2798_v39 }
  0xd3   : > { %vm422_vm7 = vc.u32 %v414_v17, %v418_v18  ;;  %v424_v47 = vadd.s32 %v418_v18, %v414_v17  ;;  %v445_v48 = vsel %vm444_vm6, 1, %v2435_v7  ;;  %v399_v22 = vsel %vm395_vm3, %v2803_v43, %v398_v58 }
  0xd4   : > { %v423_v51 = vsel %vm422_vm7, 1, %v2435_v7  ;;  %v447_v53 = vadd.s32 %v445_v48, %v439_v27  ;;  %vm448_vm8 = vc.u32 %v446_v41, %v442_v32  ;;  %v421_v63 = vshrl.u32 %v416_v26, 16 }
  0xd5   : > { %v425_v57 = vadd.s32 %v423_v51, %v417_v36  ;;  %vm426_vm9 = vc.u32 %v424_v47, %v420_v37  ;;  %v449_v60 = vsel %vm448_vm8, 1, %v2435_v7  ;;  %v443_v1 = vshrl.u32 %v438_v14, 16 }
  0xd6   : > { %v427_v59 = vsel %vm426_vm9, 1, %v2435_v7  ;;  %v451_v2 = vadd.s32 %v449_v60, %v447_v53  ;;  %v543_v3 = vor.u32 %v542_v45, %v541_v42  ;;  %v545_v44 = vshrl.u32 %v2441_v46, %v2781_v23 }
  0xd7   : > { %v429_v0 = vadd.s32 %v427_v59, %v425_v57  ;;  %v400_v4 = vsel %vm394_vm4, %v397_v61, %v399_v22  ;;  %v2890_v10 = vadd.s32 %v446_v41, %v442_v32  ;;  %vm547_vm10 = vcmp.lt.s32.totalorder %v2854_v12, 1 }
  0xd8   : > { %v452_v39 = vadd.s32 %v451_v2, %v441_v52  ;;  %v546_v11 = vor.u32 %v545_v44, %v544_v49  ;;  %vm549_vm11 = vcmp.lt.s32.totalorder %v2854_v12, 3  ;;  %vm550_vm12 = vcmp.lt.s32.totalorder %v2854_v12, 4 }
  0xd9   : > { %v430_v9 = vadd.s32 %v429_v0, %v419_v56  ;;  %vm548_vm13 = vcmp.lt.s32.totalorder %v2854_v12, 2  ;;  %v555_v28 = vsel %vm547_vm10, %v2857_v16, %v2859_v33  ;;  %v556_v14 = vsel %vm550_vm12, %v543_v3, 920167782 }
  0xda   : > { %v453_v13 = vadd.s32 %v452_v39, %v443_v1  ;;  %v559_v17 = vsel %vm547_vm10, %v2859_v33, %v540_v20  ;;  %v1808_v19 = vadd.s32 4294967169, %v2852_v8  ;;  %v454_v26 = vmul.u32 %v2818_v50, %v400_v4 }
  0xdb   : > { %v2895_v43 = vadd.s32 %v430_v9, %v421_v63  ;;  %v557_v27 = vsel %vm549_vm11, %v540_v20, %v556_v14  ;;  %v560_v30 = vsel %vm550_vm12, %v546_v11, 1326507024  ;;  %v2921_v8 = vshll.u32 %v523_v15, 8 }
  0xdc   : > { %v457_v32 = vadd.s32 1, %v453_v13  ;;  %v558_v35 = vsel %vm548_vm13, %v555_v28, %v557_v27  ;;  %v561_v36 = vsel %vm549_vm11, %v543_v3, %v560_v30  ;;  %v531_v50 = vshrl.u32 %v2437_v29, %v2781_v23 }
  0xdd   : > { %vm456_vm14 = vc.u32 %v2895_v43, %v2890_v10  ;;  %v562_v18 = vsel %vm548_vm13, %v559_v17, %v561_v36  ;;  %v588_v37 = vand.u32 65535, %v558_v35  ;;  %v589_v38 = vshrl.u32 %v558_v35, 16 }
  0xde   : > { %v458_v41 = vsel %vm456_vm14, %v457_v32, %v453_v13  ;;  %v564_v42 = vand.u32 65535, %v2921_v8  ;;  %v565_v45 = vshrl.u32 %v2921_v8, 16  ;;  %v566_v47 = vand.u32 65535, %v562_v18 }
  0xdf   : > { %v459_v48 = vadd.s32 %v458_v41, %v454_v26  ;;  %v552_v62 = vsel %vm550_vm12, %v540_v20, 2102212464  ;;  %v567_v15 = vshrl.u32 %v562_v18, 16  ;;  %v679_v23 = vadd.s32 1, %v1808_v19 }
  0xe0   : > { %v570_v49 = vmul.u32 %v566_v47, %v565_v45  ;;  %v590_v51 = vmul.u32 %v588_v37, %v564_v42  ;;  %v591_v52 = vmul.u32 %v589_v38, %v564_v42  ;;  %v568_v55 = vmul.u32 %v566_v47, %v564_v42 }
  0xe1   : > { %v460_v53 = vadd.s32 536870912, %v459_v48  ;;  %v569_v56 = vmul.u32 %v567_v15, %v564_v42  ;;  %v592_v57 = vmul.u32 %v588_v37, %v565_v45  ;;  %v551_v58 = vsel %vm547_vm10, %v531_v50, %v2857_v16 }
  0xe2   : > { %v553_v59 = vsel %vm549_vm11, %v2859_v33, %v552_v62  ;;  %v593_v60 = vmul.u32 %v589_v38, %v565_v45  ;;  %v594_v61 = vshll.u32 %v591_v52, 16  ;;  %v571_v22 = vmul.u32 %v567_v15, %v565_v45 }
  0xe3   : > { %v2937_v20 = vshrl.u32 %v460_v53, 30  ;;  %v572_v63 = vshll.u32 %v569_v56, 16  ;;  %v574_v0 = vshll.u32 %v570_v49, 16  ;;  %v573_v1 = vshrl.u32 %v569_v56, 16 }
  0xe4   : > { %v596_v2 = vshll.u32 %v592_v57, 16  ;;  %vm598_vm15 = vc.u32 %v590_v51, %v594_v61  ;;  %v600_v3 = vadd.s32 %v594_v61, %v590_v51  ;;  %v595_v33 = vshrl.u32 %v591_v52, 16 }
  0xe5   : > { %v462_v44 = vshll.u32 %v2937_v20, 30  ;;  %vm576_vm0 = vc.u32 %v568_v55, %v572_v63  ;;  %v578_v4 = vadd.s32 %v572_v63, %v568_v55  ;;  %v599_v16 = vsel %vm598_vm15, 1, %v2435_v7 }
  0xe6   : > { %v577_v9 = vsel %vm576_vm0, 1, %v2435_v7  ;;  %v601_v39 = vadd.s32 %v599_v16, %v593_v60  ;;  %vm602_vm1 = vc.u32 %v600_v3, %v596_v2  ;;  %v575_v14 = vshrl.u32 %v570_v49, 16 }
  0xe7   : > { %v463_v11 = vsub.s32 %v459_v48, %v462_v44  ;;  %v579_v28 = vadd.s32 %v577_v9, %v571_v22  ;;  %vm580_vm2 = vc.u32 %v578_v4, %v574_v0  ;;  %v603_v13 = vsel %vm602_vm1, 1, %v2435_v7 }
  0xe8   : > { %v581_v17 = vsel %vm580_vm2, 1, %v2435_v7  ;;  %v597_v19 = vshrl.u32 %v592_v57, 16  ;;  %v605_v26 = vadd.s32 %v603_v13, %v601_v39  ;;  %vm680_vm4 = vcmp.gt.s32.totalorder %v679_v23, 0  ;;  %v1214_v13 = vld [vmem:[%s2746_s5 + $0x70] sm:$0xff] }
  0xe9   : > { %vm464_vm3 = vcmp.lt.s32.totalorder %v463_v11, 0  ;;  %v465_v27 = vsub.s32 0, %v463_v11  ;;  %v583_v30 = vadd.s32 %v581_v17, %v579_v28  ;;  %v554_v32 = vsel %vm548_vm13, %v551_v58, %v553_v59  ;;  %v1230_v17 = vld [vmem:[%s2746_s5 + $0xf0] sm:$0xff] }
  0xea   : > { %v606_v35 = vadd.s32 %v605_v26, %v595_v33  ;;  %v2946_v18 = vadd.s32 %v600_v3, %v596_v2  ;;  %v681_v41 = vsel %vm680_vm4, %v679_v23, 0  ;;  %v608_v45 = vmul.u32 %v2921_v8, %v554_v32 }
  0xeb   : > { %v466_v36 = vsel %vm464_vm3, %v465_v27, %v463_v11  ;;  %v584_v50 = vadd.s32 %v583_v30, %v573_v1  ;;  %v683_v62 = vand.u32 31, %v681_v41  ;;  %v455_v15 = vadd.s32 %v2890_v10, %v2895_v43 }
  0xec   : > { %v467_v37 = vclz %v466_v36  ;;  %v607_v38 = vadd.s32 %v606_v35, %v597_v19  ;;  %v669_v23 = vand.u32 2147483647, %v2776_v21  ;;  %v2985_v33 = vshrl.u32 %v681_v41, 5  ;;  %v1231_v35 = vld [vmem:[%s2746_s5 + $0xf8] sm:$0xff]  ;;  %v1246_v36 = vld [vmem:[%s2746_s5 + $0x170] sm:$0xff] }
  0xed   : > { %v2948_v42 = vadd.s32 %v584_v50, %v575_v14  ;;  %v2956_v56 = vsub.s32 32, %v683_v62  ;;  %v686_v10 = vshll.u32 %v2437_v29, %v683_v62  ;;  %v689_v43 = vshll.u32 %v2438_v31, %v683_v62  ;;  %v1215_v14 = vld [vmem:[%s2746_s5 + $0x78] sm:$0xff]  ;;  %v1262_v41 = vld [vmem:[%s2746_s5 + $0x1f0] sm:$0xff] }
  0xee   : > { %v1803_v47 = vadd.s32 4294967294, %v467_v37  ;;  %v611_v48 = vadd.s32 1, %v607_v38  ;;  %v2962_v61 = vand.u32 8388607, %v669_v23  ;;  %v695_v1 = vshll.u32 %v2436_v25, %v683_v62  ;;  %v1247_v50 = vld [vmem:[%s2746_s5 + $0x178] sm:$0xff] }
  0xef   : > { %vm610_vm5 = vc.u32 %v2948_v42, %v2946_v18  ;;  %v687_v63 = vshrl.u32 %v2438_v31, %v2956_v56  ;;  %v690_v0 = vshrl.u32 %v2439_v34, %v2956_v56  ;;  %v696_v3 = vshrl.u32 %v2440_v40, %v2956_v56 }
  0xf0   : > { %vm1804_vm6 = vcmp.lt.s32.totalorder %v1803_v47, 0  ;;  %v612_v12 = vsel %vm610_vm5, %v611_v48, %v607_v38  ;;  %v2977_v44 = vshll.u32 %v2440_v40, %v683_v62  ;;  %v2981_v4 = vshrl.u32 %v2441_v46, %v2956_v56 }
  0xf1   : > { %v470_v49 = vsel %vm1804_vm6, 0, %v1803_v47  ;;  %v613_v51 = vadd.s32 %v612_v12, %v608_v45  ;;  %v1264_v39 = vlaneseq  ;;  %v692_v28 = vshll.u32 %v2439_v34, %v683_v62  ;;  %v1263_v45 = vld [vmem:[%s2746_s5 + $0x1f8] sm:$0xff]  ;;  %v1212_v47 = vld [vmem:[%s2746_s5 + $0x60] sm:$0xff]  ;;  %v1213_v12 = vld [vmem:[%s2746_s5 + $0x68] sm:$0xff] }
  0xf2   : > { %v471_v52 = vsub.s32 32, %v470_v49  ;;  %v475_v53 = vsub.s32 4294967266, %v470_v49  ;;  %v472_v57 = vshll.u32 %v463_v11, %v470_v49  ;;  %v677_v11 = vor.u32 8388608, %v2962_v61  ;;  %v1229_v49 = vld [vmem:[%s2746_s5 + $0xe8] sm:$0xff] }
  0xf3   : > { %v614_v55 = vadd.s32 536870912, %v613_v51  ;;  %v2993_v26 = vor.u32 %v687_v63, %v686_v10  ;;  %v2995_v27 = vor.u32 %v690_v0, %v689_v43  ;;  %v693_v30 = vshrl.u32 %v2436_v25, %v2956_v56 }
  0xf4   : > { %v476_v8 = vadd.s32 127, %v475_v53  ;;  %v473_v58 = vshrl.u32 %v455_v15, %v471_v52  ;;  %v2999_v32 = vand.u32 127, %v1264_v39  ;;  %v697_v37 = vor.u32 %v696_v3, %v695_v1  ;;  %v1228_v15 = vld [vmem:[%s2746_s5 + $0xe0] sm:$0xff]  ;;  %v1245_v53 = vld [vmem:[%s2746_s5 + $0x168] sm:$0xff] }
  0xf5   : > { %v2958_v59 = vshrl.u32 %v614_v55, 30  ;;  %v700_v38 = vor.u32 %v2981_v4, %v2977_v44  ;;  %vm704_vm8 = vcmp.lt.s32.totalorder %v2985_v33, 4  ;;  %v1244_v52 = vld [vmem:[%s2746_s5 + $0x160] sm:$0xff]  ;;  %v2442_v55 = vmov 1.0|1.0  }
  0xf6   : > { %v477_v60 = vshll.u32 %v476_v8, 23  ;;  %v474_v16 = vor.u32 %v473_v58, %v472_v57  ;;  %vm1280_vm9 = vcmp.eq.s32.totalorder %v1214_v13, %v2999_v32  ;;  %vm1281_vm10 = vcmp.eq.s32.totalorder %v1215_v14, %v2999_v32  ;;  %v1260_v57 = vld [vmem:[%s2746_s5 + $0x1e0] sm:$0xff]  ;;  %v1261_v58 = vld [vmem:[%s2746_s5 + $0x1e8] sm:$0xff] }
  0xf7   : > { %v616_v22 = vshll.u32 %v2958_v59, 30  ;;  %vm1296_vm11 = vcmp.eq.s32.totalorder %v1230_v17, %v2999_v32  ;;  %vm1297_vm12 = vcmp.eq.s32.totalorder %v1231_v35, %v2999_v32  ;;  %vm3019_vm13 = vmpackc.low %vm1281_vm10, %vm1280_vm9  ;;  %vm1312_vm14 = vcmp.eq.s32.totalorder %v1246_v36, %v2999_v32 }
  0xf8   : > { %v2972_v2 = vor.u32 4788187, %v477_v60  ;;  %v481_v48 = vcvt.s32.f32 %v474_v16  ;;  %vm1313_vm15 = vcmp.eq.s32.totalorder %v1247_v50, %v2999_v32  ;;  %vm1328_vm0 = vcmp.eq.s32.totalorder %v1262_v41, %v2999_v32  ;;  %1879 = vmatpush.bf16.msk.msra.mxu0 %vm3019_vm13, %v2442_v55  ;;  %vm3032_vm2 = vmpackc.low %vm1297_vm12, %vm1296_vm11 }
  0xf9   : > { %v2983_v9 = vsub.s32 %v613_v51, %v616_v22  ;;  %vm1329_vm1 = vcmp.eq.s32.totalorder %v1263_v45, %v2999_v32  ;;  %vm1278_vm3 = vcmp.eq.s32.totalorder %v1212_v47, %v2999_v32  ;;  %vm1279_vm4 = vcmp.eq.s32.totalorder %v1213_v12, %v2999_v32  ;;  %1895 = vmatpush.bf16.msk.msra.mxu1 %vm3032_vm2, %v2442_v55  ;;  %vm3050_vm6 = vmpackc.low %vm1313_vm15, %vm1312_vm14  ;;  %v3159_v12 = vld [vmem:[%s2739_s19 + $0x18] sm:$0xff] }
  0xfa   : > { %v479_v19 = vand.u32 2147483647, %v2972_v2  ;;  %v3040_v60 = vor.u32 %v693_v30, %v692_v28  ;;  %vm701_vm5 = vcmp.lt.s32.totalorder %v2985_v33, 1  ;;  %vm1294_vm9 = vcmp.eq.s32.totalorder %v1228_v15, %v2999_v32  ;;  %1911 = vmatpush.bf16.msk.msra.mxu2 %vm3050_vm6, %v2442_v55  ;;  %vm3066_vm12 = vmpackc.low %vm1329_vm1, %vm1328_vm0 }
  0xfb   : > { %vm618_vm7 = vcmp.lt.s32.totalorder %v2983_v9, 0  ;;  %v619_v62 = vsub.s32 0, %v2983_v9  ;;  %vm1295_vm10 = vcmp.eq.s32.totalorder %v1229_v49, %v2999_v32  ;;  %vm703_vm11 = vcmp.lt.s32.totalorder %v2985_v33, 3  ;;  %1927 = vmatpush.bf16.msk.msra.mxu3 %vm3066_vm12, %v2442_v55  ;;  %vm3082_vm0 = vmpackc.low %vm1279_vm4, %vm1278_vm3 }
  0xfc   : > { %v710_v43 = vsel %vm704_vm8, %v697_v37, 920167782  ;;  %vm1310_vm14 = vcmp.eq.s32.totalorder %v1244_v52, %v2999_v32  ;;  %v482_v63 = vmul.f32 %v481_v48, %v479_v19  ;;  %vm1326_vm1 = vcmp.eq.s32.totalorder %v1260_v57, %v2999_v32  ;;  %1881 = vmatpush.bf16.msk.msra.mxu0 %vm3082_vm0, %v2442_v55 }
  0xfd   : > { %v620_v0 = vsel %vm618_vm7, %v619_v62, %v2983_v9  ;;  %vm1327_vm15 = vcmp.eq.s32.totalorder %v1261_v58, %v2999_v32  ;;  %v714_v3 = vsel %vm704_vm8, %v700_v38, 1326507024  ;;  %vm3097_vm7 = vmpackc.low %vm1295_vm10, %vm1294_vm9  ;;  %vm702_vm3 = vcmp.lt.s32.totalorder %v2985_v33, 2 }
  0xfe   : > { %v621_v2 = vclz %v620_v0  ;;  %v709_v4 = vsel %vm701_vm5, %v2993_v26, %v2995_v27  ;;  %v711_v16 = vsel %vm703_vm11, %v3040_v60, %v710_v43  ;;  %1897 = vmatpush.bf16.msk.msra.mxu1 %vm3097_vm7, %v2442_v55  ;;  %vm4222_vm4 = vcmp.eq.s32.totalorder %v1245_v53, %v2999_v32  ;;  %vm3123_vm10 = vmpackc.low %vm1327_vm15, %vm1326_vm1 }
  0xff   : > { %vm3116_vm9 = vmpackc.low %vm4222_vm4, %vm1310_vm14  ;;  %v4225_v13 = vmov 0  ;;  %v713_v14 = vsel %vm701_vm5, %v2995_v27, %v3040_v60  ;;  %v715_v17 = vsel %vm703_vm11, %v697_v37, %v714_v3  ;;  %v3135_v19 = vshll.u32 %v677_v11, 8  ;;  %1929 = vmatpush.bf16.msk.msra.mxu3 %vm3123_vm10, %v2442_v55 }
 0x100   : > { %v1806_v28 = vadd.s32 4294967294, %v621_v2  ;;  %1913 = vmatpush.bf16.msk.msra.mxu2 %vm3116_vm9, %v2442_v55  ;;  %v4226_v13 = vsel %vm3123_vm10, 4294967295, %v4225_v13  ;;  %v483_v30 = vxor.u32 2147483648, %v482_v63  ;;  %v609_v35 = vadd.s32 %v2946_v18, %v2948_v42 }
 0x101   : > { %v712_v36 = vsel %vm702_vm3, %v709_v4, %v711_v16  ;;  %vm4145_vm15 = vcmp.lt.s32.totalorder %v2766_v5, 0  ;;  %v716_v38 = vsel %vm702_vm3, %v713_v14, %v715_v17  ;;  %v718_v41 = vand.u32 65535, %v3135_v19 }
 0x102   : > { %vm1807_vm14 = vcmp.lt.s32.totalorder %v1806_v28, 0  ;;  %v719_v45 = vshrl.u32 %v3135_v19, 16  ;;  %v720_v18 = vand.u32 65535, %v716_v38  ;;  %v743_v42 = vshrl.u32 %v712_v36, 16 }
 0x103   : > { %v624_v50 = vsel %vm1807_vm14, 0, %v1806_v28  ;;  %vm3152_vm1 = vcmp.le.f32.partialorder %v361_v24, 0.7853982  ;;  %v484_v48 = vsel %vm4145_vm15, %v483_v30, %v482_v63  ;;  %v721_v52 = vshrl.u32 %v716_v38, 16 }
 0x104   : > { %v625_v37 = vsub.s32 32, %v624_v50  ;;  %v626_v61 = vshll.u32 %v2983_v9, %v624_v50  ;;  %v629_v11 = vsub.s32 4294967266, %v624_v50  ;;  %v742_v53 = vand.u32 65535, %v712_v36 }
 0x105   : > { %v3164_v57 = vsel %vm3152_vm1, %v2766_v5, %v484_v48  ;;  %v724_v24 = vmul.u32 %v720_v18, %v719_v45  ;;  %v745_v58 = vmul.u32 %v743_v42, %v718_v41  ;;  %v722_v2 = vmul.u32 %v720_v18, %v718_v41 }
 0x106   : > { %v627_v9 = vshrl.u32 %v609_v35, %v625_v37  ;;  %v630_v62 = vadd.s32 127, %v629_v11  ;;  %v723_v3 = vmul.u32 %v721_v52, %v718_v41  ;;  %v3167_v63 = vmul.f32 0.5235988, %v3159_v12 }
 0x107   : > { %v685_v4 = vshrl.u32 %v2437_v29, %v2956_v56  ;;  %v725_v16 = vmul.u32 %v721_v52, %v719_v45  ;;  %v728_v17 = vshll.u32 %v724_v24, 16  ;;  %v746_v30 = vmul.u32 %v742_v53, %v719_v45 }
 0x108   : > { %v628_v15 = vor.u32 %v627_v9, %v626_v61  ;;  %v631_v49 = vshll.u32 %v630_v62, 23  ;;  %v726_v14 = vshll.u32 %v723_v3, 16  ;;  %v3173_v35 = vmul.f32 %v3164_v57, %v3164_v57 }
 0x109   : > { %v744_v36 = vmul.u32 %v742_v53, %v718_v41  ;;  %v748_v50 = vshll.u32 %v745_v58, 16  ;;  %v705_v11 = vsel %vm701_vm5, %v685_v4, %v2993_v26  ;;  %v747_v38 = vmul.u32 %v743_v42, %v719_v45 }
 0x10a   : > { %v632_v43 = vor.u32 4788187, %v631_v49  ;;  %v635_v0 = vcvt.s32.f32 %v628_v15  ;;  %vm730_vm4 = vc.u32 %v722_v2, %v726_v14  ;;  %v732_v61 = vadd.s32 %v726_v14, %v722_v2 }
 0x10b   : > { %v731_v56 = vsel %vm730_vm4, 1, %v2435_v7  ;;  %v826_v18 = vand.u32 2139095040, %v3167_v63  ;;  %v727_v48 = vshrl.u32 %v723_v3, 16  ;;  %v750_v62 = vshll.u32 %v746_v30, 16 }
 0x10c   : > { %v633_v28 = vand.u32 2147483647, %v632_v43  ;;  %v733_v9 = vadd.s32 %v731_v56, %v725_v16  ;;  %vm734_vm14 = vc.u32 %v732_v61, %v728_v17  ;;  %v497_v15 = vmul.f32 -0.00019511016, %v3173_v35 }
 0x10d   : > { %v706_v41 = vsel %vm704_vm8, %v3040_v60, 2102212464  ;;  %v735_v49 = vsel %vm734_vm14, 1, %v2435_v7  ;;  %vm752_vm15 = vc.u32 %v744_v36, %v748_v50  ;;  %v754_v45 = vadd.s32 %v748_v50, %v744_v36 }
 0x10e   : > { %v636_v37 = vmul.f32 %v635_v0, %v633_v28  ;;  %v737_v26 = vadd.s32 %v735_v49, %v733_v9  ;;  %v753_v53 = vsel %vm752_vm15, 1, %v2435_v7  ;;  %vm517_vm5 = vcmp.lt.s32.totalorder %v2768_v6, 0 }
 0x10f   : > { %v729_v42 = vshrl.u32 %v724_v24, 16  ;;  %v755_v43 = vadd.s32 %v753_v53, %v747_v38  ;;  %v827_v0 = vshrl.u32 %v826_v18, 23  ;;  %v707_v2 = vsel %vm703_vm11, %v2995_v27, %v706_v41 }
 0x110   : > { %v637_v52 = vxor.u32 2147483648, %v636_v37  ;;  %v738_v3 = vadd.s32 %v737_v26, %v727_v48  ;;  %v749_v4 = vshrl.u32 %v745_v58, 16  ;;  %vm756_vm8 = vc.u32 %v754_v45, %v750_v62 }
 0x111   : > { %v490_v60 = vmul.f32 -0.001358992, %v3173_v35  ;;  %vm3193_vm4 = vcmp.le.f32.partialorder %v515_v54, 0.7853982  ;;  %v757_v28 = vsel %vm756_vm8, 1, %v2435_v7  ;;  %v1811_v24 = vadd.s32 4294967169, %v827_v0 }
 0x112   : > { %v498_v14 = vadd.f32 0.008332121, %v497_v15  ;;  %v638_v17 = vsel %vm517_vm5, %v637_v52, %v636_v37  ;;  %v751_v36 = vshrl.u32 %v746_v30, 16  ;;  %v759_v27 = vadd.s32 %v757_v28, %v755_v43 }
 0x113   : > { %v3200_v50 = vadd.s32 %v738_v3, %v729_v42  ;;  %v3202_v58 = vadd.s32 %v754_v45, %v750_v62  ;;  %v833_v61 = vadd.s32 1, %v1811_v24  ;;  %v708_v54 = vsel %vm702_vm3, %v705_v11, %v707_v2 }
 0x114   : > { %v760_v56 = vadd.s32 %v759_v27, %v749_v4  ;;  %v485_v38 = vsub.s32 4, %v2937_v20  ;;  %v491_v18 = vadd.f32 0.041655596, %v490_v60  ;;  %v3210_v48 = vsel %vm3193_vm4, %v2768_v6, %v638_v17 }
 0x115   : > { %vm834_vm11 = vcmp.gt.s32.totalorder %v833_v61, 0  ;;  %v499_v30 = vmul.f32 %v498_v14, %v3173_v35  ;;  %v823_v9 = vand.u32 2147483647, %v3167_v63  ;;  %v762_v15 = vmul.u32 %v3135_v19, %v708_v54 }
 0x116   : > { %v761_v37 = vadd.s32 %v760_v56, %v751_v36  ;;  %v835_v62 = vsel %vm834_vm11, %v833_v61, 0  ;;  %vm764_vm3 = vc.u32 %v3200_v50, %v3202_v58  ;;  %v3219_v11 = vmul.f32 %v3210_v48, %v3210_v48 }
 0x117   : > { %v837_v33 = vand.u32 31, %v835_v62  ;;  %vm4231_vm15 = vcmp.lt.s32.totalorder %v2766_v5, 0  ;;  %v492_v52 = vmul.f32 %v491_v18, %v3173_v35  ;;  %v639_v26 = vsub.s32 4, %v2958_v59 }
 0x118   : > { %v765_v41 = vadd.s32 1, %v761_v37  ;;  %v3224_v49 = vsel %vm4231_vm15, %v485_v38, %v2937_v20  ;;  %v500_v19 = vadd.f32 -0.16666654, %v499_v30  ;;  %v644_v45 = vmul.f32 -0.001358992, %v3219_v11 }
 0x119   : > { %v3228_v53 = vsub.s32 32, %v837_v33  ;;  %v830_v43 = vand.u32 8388607, %v823_v9  ;;  %v840_v2 = vshll.u32 %v2437_v29, %v837_v33  ;;  %v843_v3 = vshll.u32 %v2438_v31, %v837_v33 }
 0x11a   : > { %v766_v42 = vsel %vm764_vm3, %v765_v41, %v761_v37  ;;  %v651_v4 = vmul.f32 -0.00019511016, %v3219_v11  ;;  %v3238_v60 = vshrl.u32 %v835_v62, 5  ;;  %v849_v24 = vshll.u32 %v2436_v25, %v837_v33 }
 0x11b   : > { %v767_v0 = vadd.s32 %v766_v42, %v762_v15  ;;  %v841_v20 = vshrl.u32 %v2438_v31, %v3228_v53  ;;  %v844_v28 = vshrl.u32 %v2439_v34, %v3228_v53  ;;  %v846_v17 = vshll.u32 %v2439_v34, %v837_v33 }
 0x11c   : > { %v847_v36 = vshrl.u32 %v2436_v25, %v3228_v53  ;;  %v850_v27 = vshrl.u32 %v2440_v40, %v3228_v53  ;;  %v3251_v31 = vsel %vm517_vm5, %v639_v26, %v2958_v59  ;;  %v645_v61 = vadd.f32 0.041655596, %v644_v45 }
 0x11d   : > { %v768_v14 = vadd.s32 536870912, %v767_v0  ;;  %v831_v54 = vor.u32 8388608, %v830_v43  ;;  %v852_v56 = vshll.u32 %v2440_v40, %v837_v33  ;;  %v3256_v18 = vor.u32 %v841_v20, %v840_v2 }
 0x11e   : > { %v3258_v34 = vor.u32 %v844_v28, %v843_v3  ;;  %v853_v25 = vshrl.u32 %v2441_v46, %v3228_v53  ;;  %v493_v30 = vadd.f32 -0.4999988, %v492_v52  ;;  %v501_v37 = vmul.f32 %v500_v19, %v3173_v35 }
 0x11f   : > { %v3254_v38 = vshrl.u32 %v768_v14, 30  ;;  %v851_v62 = vor.u32 %v850_v27, %v849_v24  ;;  %vm855_vm14 = vcmp.lt.s32.totalorder %v3238_v60, 1  ;;  %v488_v59 = vsel %vm3152_vm1, 0, %v3224_v49 }
 0x120   : > { %v652_v40 = vadd.f32 0.008332121, %v651_v4  ;;  %v848_v33 = vor.u32 %v847_v36, %v846_v17  ;;  %v854_v41 = vor.u32 %v853_v25, %v852_v56  ;;  %vm857_vm5 = vcmp.lt.s32.totalorder %v3238_v60, 3 }
 0x121   : > { %v770_v15 = vshll.u32 %v3254_v38, 30  ;;  %vm858_vm8 = vcmp.lt.s32.totalorder %v3238_v60, 4  ;;  %v3270_v46 = vshll.u32 %v831_v54, 8  ;;  %v646_v52 = vmul.f32 %v645_v61, %v3219_v11 }
 0x122   : > { %vm4146_vm11 = vcmp.lt.s32.totalorder %v3238_v60, 2  ;;  %v863_v47 = vsel %vm855_vm14, %v3256_v18, %v3258_v34  ;;  %v494_v49 = vmul.f32 %v493_v30, %v3173_v35  ;;  %v502_v19 = vadd.f32 1.0, %v501_v37 }
 0x123   : > { %v771_v26 = vsub.s32 %v767_v0, %v770_v15  ;;  %v642_v45 = vsel %vm3193_vm4, 0, %v3251_v31  ;;  %v864_v42 = vsel %vm858_vm8, %v851_v62, 920167782  ;;  %v653_v43 = vmul.f32 %v652_v40, %v3219_v11 }
 0x124   : > { %v865_v2 = vsel %vm857_vm5, %v848_v33, %v864_v42  ;;  %v867_v35 = vsel %vm855_vm14, %v3258_v34, %v848_v33  ;;  %v868_v3 = vsel %vm858_vm8, %v854_v41, 1326507024  ;;  %v872_v4 = vand.u32 65535, %v3270_v46 }
 0x125   : > { %vm772_vm1 = vcmp.lt.s32.totalorder %v771_v26, 0  ;;  %v773_v0 = vsub.s32 0, %v771_v26  ;;  %v866_v20 = vsel %vm4146_vm11, %v863_v47, %v865_v2  ;;  %v647_v28 = vadd.f32 -0.4999988, %v646_v52 }
 0x126   : > { %v869_v14 = vsel %vm857_vm5, %v851_v62, %v868_v3  ;;  %v873_v17 = vshrl.u32 %v3270_v46, 16  ;;  %v896_v61 = vand.u32 65535, %v866_v20  ;;  %v897_v54 = vshrl.u32 %v866_v20, 16 }
 0x127   : > { %v774_v24 = vsel %vm772_vm1, %v773_v0, %v771_v26  ;;  %v870_v27 = vsel %vm4146_vm11, %v867_v35, %v869_v14  ;;  %v3300_v56 = vadd.f32 1.0, %v494_v49  ;;  %v3302_v25 = vand.u32 3, %v488_v59 }
 0x128   : > { %v775_v36 = vclz %v774_v24  ;;  %v874_v30 = vand.u32 65535, %v870_v27  ;;  %v875_v37 = vshrl.u32 %v870_v27, 16  ;;  %v3305_v40 = vmul.f32 %v502_v19, %v3164_v57 }
 0x129   : > { %v763_v62 = vadd.s32 %v3202_v58, %v3200_v50  ;;  %v899_v41 = vmul.u32 %v897_v54, %v872_v4  ;;  %v654_v52 = vadd.f32 -0.16666654, %v653_v43  ;;  %v648_v2 = vmul.f32 %v647_v28, %v3219_v11 }
 0x12a   : > { %v1809_v15 = vadd.s32 4294967294, %v775_v36  ;;  %v876_v47 = vmul.u32 %v874_v30, %v872_v4  ;;  %v877_v42 = vmul.u32 %v875_v37, %v872_v4  ;;  %v878_v0 = vmul.u32 %v874_v30, %v873_v17 }
 0x12b   : > { %v898_v49 = vmul.u32 %v896_v61, %v872_v4  ;;  %v900_v59 = vmul.u32 %v896_v61, %v873_v17  ;;  %v879_v35 = vmul.u32 %v875_v37, %v873_v17  ;;  %v902_v24 = vshll.u32 %v899_v41, 16 }
 0x12c   : > { %vm1810_vm3 = vcmp.lt.s32.totalorder %v1809_v15, 0  ;;  %v880_v3 = vshll.u32 %v877_v42, 16  ;;  %v882_v27 = vshll.u32 %v878_v0, 16  ;;  %v655_v50 = vmul.f32 %v654_v52, %v3219_v11 }
 0x12d   : > { %v778_v20 = vsel %vm1810_vm3, 0, %v1809_v15  ;;  %v839_v58 = vshrl.u32 %v2437_v29, %v3228_v53  ;;  %v901_v43 = vmul.u32 %v897_v54, %v873_v17  ;;  %vm671_vm1 = vcmp.lt.s32.totalorder %v2776_v21, 0 }
 0x12e   : > { %v779_v57 = vsub.s32 32, %v778_v20  ;;  %v780_v19 = vshll.u32 %v771_v26, %v778_v20  ;;  %v783_v14 = vsub.s32 4294967266, %v778_v20  ;;  %vm884_vm15 = vc.u32 %v876_v47, %v880_v3 }
 0x12f   : > { %v885_v4 = vsel %vm884_vm15, 1, %v2435_v7  ;;  %v886_v61 = vadd.s32 %v880_v3, %v876_v47  ;;  %v860_v30 = vsel %vm858_vm8, %v848_v33, 2102212464  ;;  %v881_v26 = vshrl.u32 %v877_v42, 16 }
 0x130   : > { %v781_v36 = vshrl.u32 %v763_v62, %v779_v57  ;;  %v784_v28 = vadd.s32 127, %v783_v14  ;;  %v887_v37 = vadd.s32 %v885_v4, %v879_v35  ;;  %v904_v15 = vshll.u32 %v900_v59, 16 }
 0x131   : > { %vm888_vm3 = vc.u32 %v886_v61, %v882_v27  ;;  %vm906_vm11 = vc.u32 %v898_v49, %v902_v24  ;;  %v883_v29 = vshrl.u32 %v878_v0, 16  ;;  %v908_v54 = vadd.s32 %v902_v24, %v898_v49 }
 0x132   : > { %v782_v20 = vor.u32 %v781_v36, %v780_v19  ;;  %v785_v11 = vshll.u32 %v784_v28, 23  ;;  %v889_v53 = vsel %vm888_vm3, 1, %v2435_v7  ;;  %v907_v17 = vsel %vm906_vm11, 1, %v2435_v7 }
 0x133   : > { %v891_v47 = vadd.s32 %v889_v53, %v887_v37  ;;  %v909_v3 = vadd.s32 %v907_v17, %v901_v43  ;;  %v656_v57 = vadd.f32 1.0, %v655_v50  ;;  %v859_v33 = vsel %vm855_vm14, %v839_v58, %v3256_v18 }
 0x134   : > { %v786_v62 = vor.u32 4788187, %v785_v11  ;;  %v789_v52 = vcvt.s32.f32 %v782_v20  ;;  %v903_v42 = vshrl.u32 %v899_v41, 16  ;;  %vm910_vm8 = vc.u32 %v908_v54, %v904_v15 }
 0x135   : > { %v861_v0 = vsel %vm857_vm5, %v3258_v34, %v860_v30  ;;  %v892_v19 = vadd.s32 %v891_v47, %v881_v26  ;;  %v911_v14 = vsel %vm910_vm8, 1, %v2435_v7  ;;  %v659_v49 = vand.u32 3, %v642_v45 }
 0x136   : > { %v787_v35 = vand.u32 2147483647, %v786_v62  ;;  %vm3332_vm11 = vcmp.le.f32.partialorder %v669_v23, 0.7853982  ;;  %v905_v18 = vshrl.u32 %v900_v59, 16  ;;  %v913_v41 = vadd.s32 %v911_v14, %v909_v3  ;;  %v3368_v62 = vpop.permute.xlu0 %1008 }
 0x137   : > { %v793_v50 = vsub.s32 4, %v3254_v38  ;;  %v3337_v34 = vadd.s32 %v892_v19, %v883_v29  ;;  %v3339_v58 = vadd.s32 %v908_v54, %v904_v15  ;;  %v649_v43 = vadd.f32 1.0, %v648_v2 }
 0x138   : > { %v790_v27 = vmul.f32 %v789_v52, %v787_v35  ;;  %v657_v16 = vmul.f32 %v656_v57, %v3210_v48  ;;  %vm4234_vm4 = vcmp.lt.s32.totalorder %v3238_v60, 2  ;;  %v914_v45 = vadd.s32 %v913_v41, %v903_v42  ;;  %v3390_v41 = vld [vmem:[%s2739_s19 + $0x10] sm:$0xff] }
 0x139   : > { %v862_v31 = vsel %vm4234_vm4, %v859_v33, %v861_v0  ;;  %vm506_vm14 = vcmp.lt.s32.totalorder %v3302_v25, 2  ;;  %v508_v23 = vxor.u32 2147483648, %v3305_v40  ;;  %v511_v59 = vxor.u32 2147483648, %v3300_v56 }
 0x13a   : > { %v791_v36 = vxor.u32 2147483648, %v790_v27  ;;  %vm507_vm5 = vcmp.eq.s32.totalorder %v3302_v25, 0  ;;  %vm510_vm15 = vcmp.eq.s32.totalorder %v3302_v25, 2  ;;  %v915_v28 = vadd.s32 %v914_v45, %v905_v18  ;;  %v3382_v18 = vld [vmem:[%s2739_s19] sm:$0xff] }
 0x13b   : > { %v794_v60 = vsel %vm671_vm1, %v793_v50, %v3254_v38  ;;  %v916_v2 = vmul.u32 %v3270_v46, %v862_v31  ;;  %vm918_vm8 = vc.u32 %v3337_v34, %v3339_v58  ;;  %v662_v4 = vxor.u32 2147483648, %v657_v16 }
 0x13c   : > { %v792_v48 = vsel %vm671_vm1, %v791_v36, %v790_v27  ;;  %v665_v61 = vxor.u32 2147483648, %v649_v43  ;;  %v919_v26 = vadd.s32 1, %v915_v28  ;;  %v509_v37 = vsel %vm507_vm5, %v3300_v56, %v508_v23 }
 0x13d   : > { %v795_v30 = vsel %vm3332_vm11, %v2776_v21, %v792_v48  ;;  %v512_v15 = vsel %vm510_vm15, %v511_v59, %v3305_v40  ;;  %vm664_vm4 = vcmp.eq.s32.totalorder %v659_v49, 2  ;;  %v796_v38 = vsel %vm3332_vm11, 0, %v794_v60 }
 0x13e   : > { %v797_v20 = vmul.f32 %v795_v30, %v795_v30  ;;  %v920_v46 = vsel %vm918_vm8, %v919_v26, %v915_v28  ;;  %vm504_vm1 = vweird.f32 %v2766_v5  ;;  %v513_v17 = vsel %vm506_vm14, %v509_v37, %v512_v15  ;;  %v3386_v5 = vld [vmem:[%s2739_s19 + $0x8] sm:$0xff] }
 0x13f   : > { %v921_v53 = vadd.s32 %v920_v46, %v916_v2  ;;  %vm660_vm3 = vcmp.lt.s32.totalorder %v659_v49, 2  ;;  %vm4235_vm10 = vcmp.eq.s32.totalorder %v659_v49, 0  ;;  %v666_v56 = vsel %vm664_vm4, %v665_v61, %v657_v16 }
 0x140   : > { %v798_v11 = vmul.f32 -0.001358992, %v797_v20  ;;  %v805_v29 = vmul.f32 -0.00019511016, %v797_v20  ;;  %v663_v54 = vsel %vm4235_vm10, %v649_v43, %v662_v4  ;;  %v813_v47 = vand.u32 3, %v796_v38  ;;  %v1013_v4 = vpop.permute.xlu0 %1012 }
 0x141   : > { %v922_v3 = vadd.s32 536870912, %v921_v53  ;;  %v3372_v25 = vsel %vm504_vm1, nan, %v513_v17  ;;  %v667_v35 = vsel %vm660_vm3, %v663_v54, %v666_v56  ;;  %vm4148_vm10 = vcmp.lt.s32.totalorder %v3167_v63, 0 }
 0x142   : > { %v799_v40 = vadd.f32 0.041655596, %v798_v11  ;;  %v806_v52 = vadd.f32 0.008332121, %v805_v29  ;;  %vm3377_vm14 = vcmp.le.f32.partialorder %v823_v9, 0.7853982  ;;  %vm658_vm4 = vweird.f32 %v2768_v6 }
 0x143   : > { %v923_v42 = vshrl.u32 %v922_v3, 30  ;;  %vm990_vm15 = vcmp.eq.f32.partialorder %v3382_v18, 1.0  ;;  %vm991_vm3 = vcmp.eq.f32.partialorder %v3386_v5, 1.0  ;;  %vm992_vm8 = vcmp.eq.f32.partialorder %v3390_v41, 1.0 }
 0x144   : > { %v800_v57 = vmul.f32 %v799_v40, %v797_v20  ;;  %v807_v33 = vmul.f32 %v806_v52, %v797_v20  ;;  %vm993_vm1 = vcmp.eq.f32.partialorder %v3159_v12, 1.0  ;;  %v994_v16 = vsel %vm990_vm15, 1, %v2435_v7 }
 0x145   : > { %v924_v49 = vshll.u32 %v923_v42, 30  ;;  %v947_v24 = vsub.s32 4, %v923_v42  ;;  %v995_v31 = vsel %vm991_vm3, 1, %v2435_v7  ;;  %v996_v45 = vsel %vm992_vm8, 1, %v2435_v7 }
 0x146   : > { %v801_v0 = vadd.f32 -0.4999988, %v800_v57  ;;  %v808_v19 = vadd.f32 -0.16666654, %v807_v33  ;;  %v997_v28 = vsel %vm993_vm1, 1, %v2435_v7  ;;  %v998_v48 = vperm.slane %v994_v16, 6 }
 0x147   : > { %v925_v50 = vsub.s32 %v921_v53, %v924_v49  ;;  %v948_v43 = vsel %vm4148_vm10, %v947_v24, %v923_v42  ;;  %v999_v60 = vperm.slane %v995_v31, 6  ;;  %v1000_v2 = vperm.slane %v996_v45, 6 }
 0x148   : > { %v802_v9 = vmul.f32 %v801_v0, %v797_v20  ;;  %v809_v27 = vmul.f32 %v808_v19, %v797_v20  ;;  %v1001_v15 = vperm.slane %v997_v28, 6  ;;  %vm815_vm10 = vcmp.eq.s32.totalorder %v813_v47, 0 }
 0x149   : > { %vm926_vm5 = vcmp.lt.s32.totalorder %v925_v50, 0  ;;  %v927_v36 = vsub.s32 0, %v925_v50  ;;  %v917_v20 = vadd.s32 %v3339_v58, %v3337_v34  ;;  %vm1002_vm15 = vcmp.eq.s32.totalorder %v998_v48, 1 }
 0x14a   : > { %v803_v23 = vadd.f32 1.0, %v802_v9  ;;  %v810_v59 = vadd.f32 1.0, %v809_v27  ;;  %vm4238_vm3 = vcmp.eq.s32.totalorder %v813_v47, 2  ;;  %vm1003_vm8 = vcmp.eq.s32.totalorder %v999_v60, 1 }
 0x14b   : > { %v928_v37 = vsel %vm926_vm5, %v927_v36, %v925_v50  ;;  %vm1004_vm11 = vcmp.eq.s32.totalorder %v1000_v2, 1  ;;  %v950_v29 = vsel %vm3377_vm14, 0, %v948_v43  ;;  %vm1005_vm1 = vcmp.eq.s32.totalorder %v1001_v15, 1 }
 0x14c   : > { %v811_v61 = vmul.f32 %v810_v59, %v795_v30  ;;  %v819_v26 = vxor.u32 2147483648, %v803_v23  ;;  %v929_v38 = vclz %v928_v37  ;;  %v3408_v30 = vsel %vm1002_vm15, %v3368_v62, %v1013_v4 }
 0x14d   : > { %v1019_v17 = vperm.slane %v3382_v18, 0  ;;  %v1020_v34 = vperm.slane %v3386_v5, 0  ;;  %v1021_v58 = vperm.slane %v3390_v41, 0  ;;  %vm4239_vm5 = vcmp.lt.s32.totalorder %v813_v47, 2 }
 0x14e   : > { %v816_v46 = vxor.u32 2147483648, %v811_v61  ;;  %v820_v11 = vsel %vm4238_vm3, %v819_v26, %v811_v61  ;;  %v1812_v7 = vadd.s32 4294967294, %v929_v38  ;;  %v3415_v56 = vsel %vm1003_vm8, %v3368_v62, %v1013_v4 }
 0x14f   : > { %v3418_v40 = vsel %vm1004_vm11, %v3368_v62, %v1013_v4  ;;  %v3421_v3 = vsel %vm1005_vm1, %v3368_v62, %v1013_v4  ;;  %v1022_v57 = vperm.slane %v3159_v12, 0  ;;  %v1023_v33 = vsub.f32 %v1019_v17, %v3408_v30 }
 0x150   : > { %v817_v53 = vsel %vm815_vm10, %v803_v23, %v816_v46  ;;  %vm1813_vm3 = vcmp.lt.s32.totalorder %v1812_v7, 0  ;;  %v668_v42 = vsel %vm658_vm4, nan, %v667_v35  ;;  %vm4240_vm10 = vweird.f32 %v2776_v21 }
 0x151   : > { %v821_v54 = vsel %vm4239_vm5, %v817_v53, %v820_v11  ;;  %v932_v52 = vsel %vm1813_vm3, 0, %v1812_v7  ;;  %v3429_v24 = vand.u32 3, %v950_v29  ;;  %v1024_v9 = vsub.f32 %v1020_v34, %v3415_v56 }
 0x152   : > { %v933_v47 = vsub.s32 32, %v932_v52  ;;  %v934_v0 = vshll.u32 %v925_v50, %v932_v52  ;;  %v937_v19 = vsub.s32 4294967266, %v932_v52  ;;  %v822_v49 = vsel %vm4240_vm10, nan, %v821_v54 }
 0x153   : > { %v1025_v62 = vsub.f32 %v1021_v58, %v3418_v40  ;;  %v1026_v16 = vsub.f32 %v1022_v57, %v3421_v3  ;;  %v1027_v31 = vmul.f32 %v1023_v33, %v1023_v33  ;;  %v1028_v45 = vmul.f32 %v1024_v9, %v1024_v9 }
 0x154   : > { %v935_v27 = vshrl.u32 %v917_v20, %v933_v47  ;;  %v938_v43 = vadd.s32 127, %v937_v19  ;;  %v1047_v35 = vperm.slane %v3382_v18, 5  ;;  %v1048_v50 = vperm.slane %v3386_v5, 5 }
 0x155   : > { %v1029_v6 = vmul.f32 %v1025_v62, %v1025_v62  ;;  %v977_v59 = vadd.f32 1.0, %v3372_v25  ;;  %v978_v36 = vadd.f32 1.0, %v668_v42  ;;  %v979_v28 = vadd.f32 1.0, %v822_v49 }
 0x156   : > { %v936_v23 = vor.u32 %v935_v27, %v934_v0  ;;  %v939_v21 = vshll.u32 %v938_v43, 23  ;;  %v1030_v48 = vmul.f32 %v1026_v16, %v1026_v16  ;;  %v1035_v60 = vrot.slane %v1027_v31, 2 }
 0x157   : > { %v1036_v2 = vrot.slane %v1028_v45, 2  ;;  %v981_v26 = vmul.f32 %v977_v59, %v977_v59  ;;  %v982_v37 = vmul.f32 %v978_v36, %v978_v36  ;;  %v983_v15 = vmul.f32 %v979_v28, %v979_v28  ;;  %v1226_v28 = vld [vmem:[%s2746_s5 + $0xd0] sm:$0xff] }
 0x158   : > { %v940_v4 = vor.u32 4788187, %v939_v21  ;;  %v943_v61 = vcvt.s32.f32 %v936_v23  ;;  %v1037_v20 = vrot.slane %v1029_v6, 2  ;;  %v1038_v38 = vrot.slane %v1030_v48, 2  ;;  %v1211_v23 = vld [vmem:[%s2746_s5 + $0x58] sm:$0xff] }
 0x159   : > { %v1043_v46 = vmul.f32 %v1035_v60, %v3408_v30  ;;  %v985_v7 = vmul.f32 0.25, %v981_v26  ;;  %v986_v29 = vmul.f32 0.25, %v982_v37  ;;  %v1044_v53 = vmul.f32 %v1036_v2, %v3415_v56  ;;  %v1227_v48 = vld [vmem:[%s2746_s5 + $0xd8] sm:$0xff]  ;;  %v1242_v60 = vld [vmem:[%s2746_s5 + $0x150] sm:$0xff] }
 0x15a   : > { %v941_v11 = vand.u32 2147483647, %v940_v4  ;;  %v987_v25 = vmul.f32 0.25, %v983_v15  ;;  %v1045_v17 = vmul.f32 %v1037_v20, %v3418_v40  ;;  %v1046_v34 = vmul.f32 %v1038_v38, %v3421_v3  ;;  %v1258_v26 = vld [vmem:[%s2746_s5 + $0x1d0] sm:$0xff]  ;;  %v1259_v37 = vld [vmem:[%s2746_s5 + $0x1d8] sm:$0xff]  ;;  %v1208_v20 = vld [vmem:[%s2746_s5 + $0x40] sm:$0xff] }
 0x15b   : > { %v1049_v58 = vperm.slane %v3390_v41, 5  ;;  %v1050_v52 = vperm.slane %v3159_v12, 5  ;;  %v1051_v57 = vmul.f32 %v1047_v35, %v1043_v46  ;;  %v1052_v33 = vmul.f32 %v1048_v50, %v1044_v53  ;;  %v1210_v50 = vld [vmem:[%s2746_s5 + $0x50] sm:$0xff]  ;;  %v1209_v38 = vld [vmem:[%s2746_s5 + $0x48] sm:$0xff]  ;;  %v1224_v46 = vld [vmem:[%s2746_s5 + $0xc0] sm:$0xff] }
 0x15c   : > { %v944_v54 = vmul.f32 %v943_v61, %v941_v11  ;;  %v1067_v47 = vrot.slane %v3408_v30, 4  ;;  %v1068_v0 = vrot.slane %v3415_v56, 4  ;;  %v1069_v19 = vrot.slane %v3418_v40, 4  ;;  %v1243_v61 = vld [vmem:[%s2746_s5 + $0x158] sm:$0xff] }
 0x15d   : > { %v1053_v42 = vmul.f32 %v1049_v58, %v1045_v17  ;;  %v1054_v9 = vmul.f32 %v1050_v52, %v1046_v34  ;;  %v1055_v62 = vmul.f32 1.442695, %v1051_v57  ;;  %v1057_v27 = vmul.f32 1.442695, %v1052_v33  ;;  %v1225_v17 = vld [vmem:[%s2746_s5 + $0xc8] sm:$0xff]  ;;  %v1240_v34 = vld [vmem:[%s2746_s5 + $0x140] sm:$0xff] }
 0x15e   : > { %v945_v49 = vxor.u32 2147483648, %v944_v54  ;;  %v1070_v16 = vrot.slane %v3421_v3, 4  ;;  %v1083_v31 = vrot.slane %v3382_v18, 5  ;;  %v1084_v45 = vrot.slane %v3386_v5, 5  ;;  %v1241_v58 = vld [vmem:[%s2746_s5 + $0x148] sm:$0xff]  ;;  %v1239_v56 = vld [vmem:[%s2746_s5 + $0x138] sm:$0xff] }
 0x15f   : > { %v1059_v43 = vmul.f32 1.442695, %v1053_v42  ;;  %vm4241_vm11 = vcmp.lt.s32.totalorder %v3167_v63, 0  ;;  %2179 = vpow2.f32 %v1055_v62  ;;  %v1061_v6 = vmul.f32 1.442695, %v1054_v9  ;;  %v1256_v42 = vld [vmem:[%s2746_s5 + $0x1c0] sm:$0xff] }
 0x160   : > { %v946_v30 = vsel %vm4241_vm11, %v945_v49, %v944_v54  ;;  %v1085_v35 = vrot.slane %v3390_v41, 5  ;;  %2181 = vpow2.f32 %v1057_v27  ;;  %v1086_v59 = vrot.slane %v3159_v12, 5  ;;  %v1257_v49 = vld [vmem:[%s2746_s5 + $0x1c8] sm:$0xff]  ;;  %v3509_v9 = vld [vmem:[%s2746_s5 + $0x30] sm:$0xff]  ;;  %v1255_v40 = vld [vmem:[%s2746_s5 + $0x1b8] sm:$0xff] }
 0x161   : > { %v3457_v21 = vsel %vm3377_vm14, %v3167_v63, %v946_v30  ;;  %v3460_v36 = vmul.f32 %v1083_v31, %v985_v7  ;;  %2183 = vpow2.f32 %v1059_v43  ;;  %v3469_v4 = vmul.f32 %v1084_v45, %v986_v29  ;;  %v3528_v31 = vld [vmem:[%s2746_s5 + $0xb0] sm:$0xff]  ;;  %v3594_v3 = vld [vmem:[%s2746_s5 + $0xa0] sm:$0xff] }
 0x162   : > { %v3467_v2 = vmul.f32 %v3457_v21, %v3457_v21  ;;  %v3471_v14 = vmul.f32 %v1085_v35, %v987_v25  ;;  %2185 = vpow2.f32 %v1061_v6  ;;  %vm1276_vm14 = vcmp.eq.s32.totalorder %v1210_v50, %v2999_v32 }
 0x163   : > { %v1095_v15 = vperm.slane %v3460_v36, 0  ;;  %vm1277_vm4 = vcmp.eq.s32.totalorder %v1211_v23, %v2999_v32  ;;  %v1096_v29 = vperm.slane %v3469_v4, 0  ;;  %vm1292_vm8 = vcmp.eq.s32.totalorder %v1226_v28, %v2999_v32  ;;  %v1223_v23 = vld [vmem:[%s2746_s5 + $0xb8] sm:$0xff]  ;;  %v1238_v36 = vld [vmem:[%s2746_s5 + $0x130] sm:$0xff] }
 0x164   : > { %v952_v11 = vmul.f32 -0.001358992, %v3467_v2  ;;  %v959_v7 = vmul.f32 -0.00019511016, %v3467_v2  ;;  %v1097_v53 = vperm.slane %v3471_v14, 0  ;;  %vm3486_vm15 = vmpackc.low %vm1277_vm4, %vm1276_vm14  ;;  %vm1293_vm1 = vcmp.eq.s32.totalorder %v1227_v48, %v2999_v32 }
 0x165   : > { %1883 = vmatpush.bf16.msk.msra.mxu0 %vm3486_vm15, %v2442_v55  ;;  %vm1308_vm5 = vcmp.eq.s32.totalorder %v1242_v60, %v2999_v32  ;;  %vm1309_vm3 = vcmp.eq.s32.totalorder %v1243_v61, %v2999_v32  ;;  %v2180_v54 = vpop.eup %2179  ;;  %vm3500_vm10 = vmpackc.low %vm1293_vm1, %vm1292_vm8  ;;  %v4244_v33 = vmov 0  ;;  %vm1324_vm11 = vcmp.eq.s32.totalorder %v1258_v26, %v2999_v32 }
 0x166   : > { %v953_v52 = vadd.f32 0.041655596, %v952_v11  ;;  %v960_v57 = vadd.f32 0.008332121, %v959_v7  ;;  %v4245_v33 = vsel %vm3500_vm10, 4294967295, %v4244_v33  ;;  %v2182_v62 = vpop.eup %2181  ;;  %v1075_v27 = vmul.f32 %v2180_v54, %v1067_v47  ;;  %1899 = vmatpush.bf16.msk.msra.mxu1 %vm3500_vm10, %v2442_v55  ;;  %vm3519_vm8 = vmpackc.low %vm1309_vm3, %vm1308_vm5  ;;  %v1207_v47 = vld [vmem:[%s2746_s5 + $0x38] sm:$0xff] }
 0x167   : > { %v4246_v43 = vmov 0  ;;  %vm1274_vm1 = vcmp.eq.s32.totalorder %v1208_v20, %v2999_v32  ;;  %v2184_v45 = vpop.eup %2183  ;;  %v1076_v35 = vmul.f32 %v2182_v62, %v1068_v0  ;;  %1915 = vmatpush.bf16.msk.msra.mxu2 %vm3519_vm8, %v2442_v55  ;;  %vm4248_vm5 = vcmp.eq.s32.totalorder %v1259_v37, %v2999_v32  ;;  %v3550_v0 = vld [vmem:[%s2746_s5 + $0x1b0] sm:$0xff]  ;;  %v1205_v20 = vld [vmem:[%s2746_s5 + $0x28] sm:$0xff] }
 0x168   : > { %v4247_v43 = vsel %vm3519_vm8, 4294967295, %v4246_v43  ;;  %v954_v30 = vmul.f32 %v953_v52, %v3467_v2  ;;  %v961_v6 = vmul.f32 %v960_v57, %v3467_v2  ;;  %vm3541_vm3 = vmpackc.low %vm4248_vm5, %vm1324_vm11  ;;  %v4249_v50 = vmov 0  ;;  %v2186_v28 = vpop.eup %2185  ;;  %v1237_v7 = vld [vmem:[%s2746_s5 + $0x128] sm:$0xff]  ;;  %v3638_v54 = vld [vmem:[%s2746_s5 + $0x10] sm:$0xff] }
 0x169   : > { %v4250_v50 = vsel %vm3541_vm3, 4294967295, %v4249_v50  ;;  %v1077_v48 = vmul.f32 %v2184_v45, %v1069_v19  ;;  %v3555_v60 = vmul.f32 %v1095_v15, %v1075_v27  ;;  %1931 = vmatpush.bf16.msk.msra.mxu3 %vm3541_vm3, %v2442_v55  ;;  %vm4251_vm11 = vcmp.eq.s32.totalorder %v1209_v38, %v2999_v32  ;;  %v3572_v19 = vld [vmem:[%s2746_s5 + $0x20] sm:$0xff]  ;;  %v3641_v52 = vld [vmem:[%s2746_s5 + $0x18] sm:$0xff]  ;;  %v3679_v45 = vld [vmem:[%s2746_s5 + $0x190] sm:$0xff] }
 0x16a   : > { %vm3564_vm5 = vmpackc.low %vm4251_vm11, %vm1274_vm1  ;;  %v4252_v4 = vmov 0  ;;  %vm1306_vm4 = vcmp.eq.s32.totalorder %v1240_v34, %v2999_v32  ;;  %v955_v14 = vadd.f32 -0.4999988, %v954_v30  ;;  %v962_v61 = vadd.f32 -0.16666654, %v961_v6  ;;  %v3600_v38 = vld [vmem:[%s2746_s5 + $0x120] sm:$0xff] }
 0x16b   : > { %v4253_v4 = vsel %vm3564_vm5, 4294967295, %v4252_v4  ;;  %v3577_v26 = vmul.f32 %v2186_v28, %v1070_v16  ;;  %v3579_v37 = vmul.f32 %v1096_v29, %v1076_v35  ;;  %1885 = vmatpush.bf16.msk.msra.mxu0 %vm3564_vm5, %v2442_v55  ;;  %vm4254_vm1 = vcmp.eq.s32.totalorder %v1224_v46, %v2999_v32  ;;  %v3597_v16 = vld [vmem:[%s2746_s5 + $0xa8] sm:$0xff]  ;;  %v3622_v29 = vld [vmem:[%s2746_s5 + $0x1a0] sm:$0xff]  ;;  %v1251_v30 = vld [vmem:[%s2746_s5 + $0x198] sm:$0xff] }
 0x16c   : > { %vm4255_vm11 = vcmp.eq.s32.totalorder %v1225_v17, %v2999_v32  ;;  %v4256_v15 = vmov 0  ;;  %v3603_v11 = vmul.f32 %v1097_v53, %v1077_v48  ;;  %v4259_v46 = vmov 0  ;;  %v3697_v6 = vld [vmem:[%s2746_s5] sm:$0xff]  ;;  %v1217_v28 = vld [vmem:[%s2746_s5 + $0x88] sm:$0xff] }
 0x16d   : > { %vm3588_vm14 = vmpackc.low %vm4255_vm11, %vm4254_vm1  ;;  %vm4258_vm1 = vcmp.eq.s32.totalorder %v1241_v58, %v2999_v32  ;;  %vm1322_vm5 = vcmp.eq.s32.totalorder %v1256_v42, %v2999_v32  ;;  %vm1323_vm3 = vcmp.eq.s32.totalorder %v1257_v49, %v2999_v32  ;;  %vm1272_vm8 = vcmp.eq.s32.totalorder %v3509_v9, %v2999_v32  ;;  %v1253_v58 = vld [vmem:[%s2746_s5 + $0x1a8] sm:$0xff]  ;;  %v3659_v42 = vld [vmem:[%s2746_s5 + $0x98] sm:$0xff] }
 0x16e   : > { %v4257_v15 = vsel %vm3588_vm14, 4294967295, %v4256_v15  ;;  %1901 = vmatpush.bf16.msk.msra.mxu1 %vm3588_vm14, %v2442_v55  ;;  %vm3612_vm11 = vmpackc.low %vm4258_vm1, %vm1306_vm4  ;;  %v956_v53 = vmul.f32 %v955_v14, %v3467_v2  ;;  %v963_v17 = vmul.f32 %v962_v61, %v3467_v2  ;;  %v4261_v34 = vmov 0  ;;  %v3644_v2 = vld [vmem:[%s2746_s5 + $0x90] sm:$0xff]  ;;  %v1232_v48 = vld [vmem:[%s2746_s5 + $0x100] sm:$0xff] }
 0x16f   : > { %v4260_v46 = vsel %vm3612_vm11, 4294967295, %v4259_v46  ;;  %1917 = vmatpush.bf16.msk.msra.mxu2 %vm3612_vm11, %v2442_v55  ;;  %vm3629_vm4 = vmpackc.low %vm1323_vm3, %vm1322_vm5  ;;  %vm1273_vm1 = vcmp.eq.s32.totalorder %v1207_v47, %v2999_v32  ;;  %v4263_v57 = vmov 0  ;;  %vm1289_vm5 = vcmp.eq.s32.totalorder %v1223_v23, %v2999_v32  ;;  %v3662_v49 = vld [vmem:[%s2746_s5 + $0x110] sm:$0xff]  ;;  %v1235_v47 = vld [vmem:[%s2746_s5 + $0x118] sm:$0xff] }
 0x170   : > { %v4262_v34 = vsel %vm3629_vm4, 4294967295, %v4261_v34  ;;  %1933 = vmatpush.bf16.msk.msra.mxu3 %vm3629_vm4, %v2442_v55  ;;  %vm3649_vm3 = vmpackc.low %vm1273_vm1, %vm1272_vm8  ;;  %vm1304_vm14 = vcmp.eq.s32.totalorder %v1238_v36, %v2999_v32  ;;  %vm1305_vm11 = vcmp.eq.s32.totalorder %v1239_v56, %v2999_v32  ;;  %v957_v9 = vadd.f32 1.0, %v956_v53  ;;  %v1216_v56 = vld [vmem:[%s2746_s5 + $0x80] sm:$0xff]  ;;  %v1233_v61 = vld [vmem:[%s2746_s5 + $0x108] sm:$0xff] }
 0x171   : > { %v4264_v57 = vsel %vm3649_vm3, 4294967295, %v4263_v57  ;;  %v964_v62 = vadd.f32 1.0, %v963_v17  ;;  %1887 = vmatpush.bf16.msk.msra.mxu0 %vm3649_vm3, %v2442_v55  ;;  %vm4265_vm8 = vcmp.eq.s32.totalorder %v3528_v31, %v2999_v32  ;;  %v4266_v27 = vmov 0  ;;  %vm3684_vm3 = vmpackc.low %vm1305_vm11, %vm1304_vm14 }
 0x172   : > { %vm3670_vm1 = vmpackc.low %vm1289_vm5, %vm4265_vm8  ;;  %v4268_v31 = vmov 0  ;;  %v973_v23 = vxor.u32 2147483648, %v957_v9  ;;  %vm4270_vm14 = vcmp.eq.s32.totalorder %v3550_v0, %v2999_v32  ;;  %vm4271_vm11 = vcmp.eq.s32.totalorder %v1255_v40, %v2999_v32 }
 0x173   : > { %v4267_v27 = vsel %vm3670_vm1, 4294967295, %v4266_v27  ;;  %1903 = vmatpush.bf16.msk.msra.mxu1 %vm3670_vm1, %v2442_v55  ;;  %v4269_v31 = vsel %vm3684_vm3, 4294967295, %v4268_v31  ;;  %v965_v35 = vmul.f32 %v964_v62, %v3457_v21  ;;  %1919 = vmatpush.bf16.msk.msra.mxu2 %vm3684_vm3, %v2442_v55  ;;  %vm3708_vm4 = vmpackc.low %vm4271_vm11, %vm4270_vm14  ;;  %v4272_v36 = vmov 0  ;;  %v1201_v21 = vld [vmem:[%s2746_s5 + $0x8] sm:$0xff] }
 0x174   : > { %v4273_v36 = vsel %vm3708_vm4, 4294967295, %v4272_v36  ;;  %1935 = vmatpush.bf16.msk.msra.mxu3 %vm3708_vm4, %v2442_v55  ;;  %vm4274_vm5 = vcmp.eq.s32.totalorder %v3572_v19, %v2999_v32  ;;  %vm4275_vm14 = vcmp.eq.s32.totalorder %v1205_v20, %v2999_v32  ;;  %v4276_v0 = vmov 0  ;;  %v1248_v20 = vld [vmem:[%s2746_s5 + $0x180] sm:$0xff] }
 0x175   : > { %vm3725_vm11 = vmpackc.low %vm4275_vm14, %vm4274_vm5  ;;  %v970_v40 = vxor.u32 2147483648, %v965_v35  ;;  %vm4278_vm5 = vcmp.eq.s32.totalorder %v3429_v24, 2  ;;  %vm4279_vm14 = vcmp.eq.s32.totalorder %v3594_v3, %v2999_v32  ;;  %vm4280_vm3 = vcmp.eq.s32.totalorder %v3597_v16, %v2999_v32  ;;  %v1249_v16 = vld [vmem:[%s2746_s5 + $0x188] sm:$0xff] }
 0x176   : > { %v4277_v0 = vsel %vm3725_vm11, 4294967295, %v4276_v0  ;;  %v974_v19 = vsel %vm4278_vm5, %v973_v23, %v965_v35  ;;  %1889 = vmatpush.bf16.msk.msra.mxu0 %vm3725_vm11, %v2442_v55  ;;  %vm3749_vm8 = vmpackc.low %vm4280_vm3, %vm4279_vm14  ;;  %v4281_v14 = vmov 0  ;;  %vm4283_vm10 = vcmp.eq.s32.totalorder %v3600_v38, %v2999_v32 }
 0x177   : > { %v4282_v14 = vsel %vm3749_vm8, 4294967295, %v4281_v14  ;;  %1905 = vmatpush.bf16.msk.msra.mxu1 %vm3749_vm8, %v2442_v55  ;;  %vm4284_vm3 = vcmp.eq.s32.totalorder %v1237_v7, %v2999_v32  ;;  %v4285_v3 = vmov 0  ;;  %vm4287_vm8 = vcmp.eq.s32.totalorder %v3429_v24, 0 }
 0x178   : > { %vm3767_vm14 = vmpackc.low %vm4284_vm3, %vm4283_vm10  ;;  %v971_v38 = vsel %vm4287_vm8, %v957_v9, %v970_v40  ;;  %vm4288_vm10 = vcmp.eq.s32.totalorder %v3622_v29, %v2999_v32  ;;  %vm4289_vm3 = vcmp.eq.s32.totalorder %v1253_v58, %v2999_v32  ;;  %v4290_v7 = vmov 0 }
 0x179   : > { %v4286_v3 = vsel %vm3767_vm14, 4294967295, %v4285_v3  ;;  %1921 = vmatpush.bf16.msk.msra.mxu2 %vm3767_vm14, %v2442_v55  ;;  %vm3788_vm4 = vmpackc.low %vm4289_vm3, %vm4288_vm10  ;;  %vm4292_vm8 = vcmp.lt.s32.totalorder %v3429_v24, 2  ;;  %vm4293_vm14 = vcmp.eq.s32.totalorder %v3638_v54, %v2999_v32  ;;  %vm4294_vm10 = vcmp.eq.s32.totalorder %v3641_v52, %v2999_v32 }
 0x17a   : > { %v4291_v7 = vsel %vm3788_vm4, 4294967295, %v4290_v7  ;;  %v975_v53 = vsel %vm4292_vm8, %v971_v38, %v974_v19  ;;  %1937 = vmatpush.bf16.msk.msra.mxu3 %vm3788_vm4, %v2442_v55  ;;  %vm3806_vm3 = vmpackc.low %vm4294_vm10, %vm4293_vm14  ;;  %vm4297_vm11 = vweird.f32 %v3167_v63  ;;  %vm4298_vm4 = vcmp.eq.s32.totalorder %v3644_v2, %v2999_v32 }
 0x17b   : > { %v976_v24 = vsel %vm4297_vm11, nan, %v975_v53  ;;  %1891 = vmatpush.bf16.msk.msra.mxu0 %vm3806_vm3, %v2442_v55  ;;  %vm4299_vm14 = vcmp.eq.s32.totalorder %v3659_v42, %v2999_v32  ;;  %v1103_v58 = vperm.slane %v3382_v18, 1  ;;  %v1104_v63 = vperm.slane %v3386_v5, 1 }
 0x17c   : > { %vm3824_vm10 = vmpackc.low %vm4299_vm14, %vm4298_vm4  ;;  %v980_v54 = vadd.f32 1.0, %v976_v24  ;;  %vm4302_vm11 = vcmp.eq.s32.totalorder %v3662_v49, %v2999_v32  ;;  %vm4303_vm8 = vcmp.eq.s32.totalorder %v1235_v47, %v2999_v32  ;;  %v4304_v52 = vmov 0 }
 0x17d   : > { %1907 = vmatpush.bf16.msk.msra.mxu1 %vm3824_vm10, %v2442_v55  ;;  %vm3839_vm4 = vmpackc.low %vm4303_vm8, %vm4302_vm11  ;;  %v1111_v2 = vperm.slane %v3382_v18, 2  ;;  %v1112_v42 = vperm.slane %v3386_v5, 2  ;;  %v1119_v9 = vperm.slane %v3382_v18, 3  ;;  %vm4306_vm14 = vcmp.eq.s32.totalorder %v3679_v45, %v2999_v32 }
 0x17e   : > { %v4305_v52 = vsel %vm3839_vm4, 4294967295, %v4304_v52  ;;  %1923 = vmatpush.bf16.msk.msra.mxu2 %vm3839_vm4, %v2442_v55  ;;  %vm4307_vm5 = vcmp.eq.s32.totalorder %v1251_v30, %v2999_v32  ;;  %v4308_v49 = vmov 0  ;;  %v1107_v62 = vmul.f32 %v1103_v58, %v3555_v60 }
 0x17f   : > { %vm3854_vm1 = vmpackc.low %vm4307_vm5, %vm4306_vm14  ;;  %v1108_v47 = vmul.f32 %v1104_v63, %v3579_v37  ;;  %v1120_v35 = vperm.slane %v3386_v5, 3  ;;  %v1127_v23 = vperm.slane %v3382_v18, 4  ;;  %v984_v40 = vmul.f32 %v980_v54, %v980_v54  ;;  %v2190_v54 = vld [vmem:[%s2739_s19 + $0x18] sm:$0xff] }
 0x180   : > { %v4309_v49 = vsel %vm3854_vm1, 4294967295, %v4308_v49  ;;  %1939 = vmatpush.bf16.msk.msra.mxu3 %vm3854_vm1, %v2442_v55  ;;  %vm4310_vm8 = vcmp.eq.s32.totalorder %v3697_v6, %v2999_v32  ;;  %vm4311_vm5 = vcmp.eq.s32.totalorder %v1201_v21, %v2999_v32  ;;  %v4312_v45 = vmov 0 }
 0x181   : > { %vm3870_vm11 = vmpackc.low %vm4311_vm5, %vm4310_vm8  ;;  %v1115_v30 = vmul.f32 %v1111_v2, %v3555_v60  ;;  %v1116_v19 = vmul.f32 %v1112_v42, %v3579_v37  ;;  %v1123_v18 = vmul.f32 %v1119_v9, %v3555_v60  ;;  %vm4314_vm14 = vcmp.eq.s32.totalorder %v1216_v56, %v2999_v32 }
 0x182   : > { %v4313_v45 = vsel %vm3870_vm11, 4294967295, %v4312_v45  ;;  %1893 = vmatpush.bf16.msk.msra.mxu0 %vm3870_vm11, %v2442_v55  ;;  %vm4315_vm1 = vcmp.eq.s32.totalorder %v1217_v28, %v2999_v32  ;;  %v4316_v6 = vmov 0  ;;  %v1124_v21 = vmul.f32 %v1120_v35, %v3579_v37 }
 0x183   : > { %vm3884_vm4 = vmpackc.low %vm4315_vm1, %vm4314_vm14  ;;  %v1128_v38 = vperm.slane %v3386_v5, 4  ;;  %v1131_v53 = vmul.f32 %v1127_v23, %v3555_v60  ;;  %v988_v24 = vmul.f32 0.25, %v984_v40  ;;  %vm4318_vm5 = vcmp.eq.s32.totalorder %v1232_v48, %v2999_v32 }
 0x184   : > { %v4317_v6 = vsel %vm3884_vm4, 4294967295, %v4316_v6  ;;  %1909 = vmatpush.bf16.msk.msra.mxu1 %vm3884_vm4, %v2442_v55  ;;  %vm4319_vm11 = vcmp.eq.s32.totalorder %v1233_v61, %v2999_v32  ;;  %v1139_v5 = vrot.slane %v1115_v30, 6  ;;  %v1140_v60 = vrot.slane %v1116_v19, 6 }
 0x185   : > { %vm3898_vm1 = vmpackc.low %vm4319_vm11, %vm4318_vm5  ;;  %v1151_v28 = vrot.slane %v1123_v18, 4  ;;  %vm4322_vm14 = vcmp.eq.s32.totalorder %v1248_v20, %v2999_v32  ;;  %vm4323_vm8 = vcmp.eq.s32.totalorder %v1249_v16, %v2999_v32  ;;  %v1132_v51 = vmul.f32 %v1128_v38, %v3579_v37 }
 0x186   : > { %1943 = vmatpush.bf16.msk.msrb.mxu0 %vm3019_vm13, %v2442_v55  ;;  %1925 = vmatpush.bf16.msk.msra.mxu2 %vm3898_vm1, %v2442_v55  ;;  %vm3912_vm4 = vmpackc.low %vm4323_vm8, %vm4322_vm14  ;;  %v1152_v61 = vrot.slane %v1124_v21, 4  ;;  %v1163_v58 = vrot.slane %v1131_v53, 2  ;;  %vm1176_vm13 = vcmask 1043456   ;;  %v1094_v63 = vmul.f32 %v1086_v59, %v988_v24 }
 0x187   : > { %1941 = vmatpush.bf16.msk.msra.mxu3 %vm3912_vm4, %v2442_v55  ;;  %vm4326_vm11 = vcmask 1041408   ;;  %vm1181_vm8 = vcmask 1045504   ;;  %v1164_v37 = vrot.slane %v1132_v51, 2  ;;  %v1105_v20 = vperm.slane %v3390_v41, 1 }
 0x188   : > { %1959 = vmatpush.bf16.msk.msrb.mxu1 %vm3032_vm2, %v2442_v55  ;;  %v1172_v32 = vsel %vm4326_vm11, %v1107_v62, %v1139_v5  ;;  %vm4327_vm2 = vmmov %vm4326_vm11  ;;  %v1098_v16 = vperm.slane %v1094_v63, 0  ;;  %v1106_v2 = vperm.slane %v2190_v54, 1  ;;  %v1113_v42 = vperm.slane %v3390_v41, 2 }
 0x189   : > { %v1173_v8 = vsel %vm4327_vm2, %v1108_v47, %v1140_v60  ;;  %v1177_v12 = vsel %vm1176_vm13, %v1172_v32, %v1151_v28  ;;  %v1114_v9 = vperm.slane %v2190_v54, 2  ;;  %v1121_v62 = vperm.slane %v3390_v41, 3  ;;  %vm4334_vm5 = vmmov %vm4327_vm2 }
 0x18a   : > { %1975 = vmatpush.bf16.msk.msrb.mxu2 %vm3050_vm6, %v2442_v55  ;;  %v1178_v59 = vsel %vm1176_vm13, %v1173_v8, %v1152_v61  ;;  %1945 = vmatpush.bf16.msk.msrb.mxu0 %vm3082_vm0, %v2442_v55  ;;  %v1182_v10 = vsel %vm1181_vm8, %v1177_v12, %v1163_v58  ;;  %v1102_v47 = vmul.f32 %v1098_v16, %v3577_v26  ;;  %v1122_v23 = vperm.slane %v2190_v54, 3 }
 0x18b   : > { %1991 = vmatpush.bf16.msk.msrb.mxu3 %vm3066_vm12, %v2442_v55  ;;  %v1183_v22 = vsel %vm1181_vm8, %v1178_v59, %v1164_v37  ;;  %v1117_v35 = vmul.f32 %v1113_v42, %v3603_v11  ;;  %vm4328_vm6 = vnez %v4226_v13  ;;  %v1109_v44 = vmul.f32 %v1105_v20, %v3603_v11 }
 0x18c   : > { %1961 = vmatpush.bf16.msk.msrb.mxu1 %vm3097_vm7, %v2442_v55  ;;  %v3951_v1 = vpack.c.bf16 %v1183_v22, %v1182_v10  ;;  %v1125_v40 = vmul.f32 %v1121_v62, %v3603_v11  ;;  %v1129_v30 = vperm.slane %v3390_v41, 4  ;;  %v1130_v26 = vperm.slane %v2190_v54, 4 }
 0x18d   : > { %v1110_v18 = vmul.f32 %v1106_v2, %v1102_v47  ;;  %v1118_v21 = vmul.f32 %v1114_v9, %v1102_v47  ;;  %vm4329_vm12 = vnez %v4245_v33  ;;  %v1126_v13 = vmul.f32 %v1122_v23, %v1102_v47 }
 0x18e   : > { %1977 = vmatpush.bf16.msk.msrb.mxu2 %vm3116_vm9, %v2442_v55  ;;  %1947 = vmatpush.bf16.msk.msrb.mxu0 %vm3486_vm15, %v2442_v55  ;;  %v1188_v39 = vunpack.c.l.bf16 %v3951_v1  ;;  %v1189_v19 = vunpack.c.h.bf16 %v3951_v1  ;;  %v1133_v38 = vmul.f32 %v1129_v30, %v3603_v11  ;;  %v1134_v53 = vmul.f32 %v1130_v26, %v1102_v47  ;;  %vm4332_vm9 = vmmov %vm4327_vm2 }
 0x18f   : > { %1993 = vmatpush.bf16.msk.msrb.mxu3 %vm4328_vm6, %v2442_v55  ;;  %v1141_v41 = vrot.slane %v1117_v35, 6  ;;  %vm4330_vm0 = vnez %v4247_v43  ;;  %v1142_v5 = vrot.slane %v1118_v21, 6  ;;  %v1153_v60 = vrot.slane %v1125_v40, 4  ;;  %v1490_v35 = vld [vmem:[#allocation2] sm:$0xff] }
 0x190   : > { %1963 = vmatpush.bf16.msk.msrb.mxu1 %vm4329_vm12, %v2442_v55  ;;  %v1192_v25 = vsub.f32 %v1182_v10, %v1188_v39  ;;  %v1193_v24 = vsub.f32 %v1183_v22, %v1189_v19  ;;  %vm4331_vm7 = vnez %v4250_v50  ;;  %v1154_v28 = vrot.slane %v1126_v13, 4 }
 0x191   : > { %v1165_v33 = vrot.slane %v1133_v38, 2  ;;  %v1166_v51 = vrot.slane %v1134_v53, 2  ;;  %v1174_v61 = vsel %vm4332_vm9, %v1109_v44, %v1141_v41  ;;  %vm4333_vm15 = vnez %v4253_v4 }
 0x192   : > { %1979 = vmatpush.bf16.msk.msrb.mxu2 %vm4330_vm0, %v2442_v55  ;;  %1949 = vmatpush.bf16.msk.msrb.mxu0 %vm4333_vm15, %v2442_v55  ;;  %v1196_v11 = vpack.c.bf16 %v1192_v25, %v1192_v25  ;;  %v1197_v43 = vpack.c.bf16 %v1193_v24, %v1193_v24  ;;  %v1175_v58 = vsel %vm4334_vm5, %v1110_v18, %v1142_v5 }
 0x193   : > { %1995 = vmatpush.bf16.msk.msrb.mxu3 %vm4331_vm7, %v2442_v55  ;;  %v1179_v63 = vsel %vm1176_vm13, %v1174_v61, %v1153_v60  ;;  %vm4335_vm14 = vnez %v4257_v15  ;;  %v1180_v50 = vsel %vm1176_vm13, %v1175_v58, %v1154_v28  ;;  %vm4336_vm11 = vnez %v4260_v46 }
 0x194   : > { %1965 = vmatpush.bf16.msk.msrb.mxu1 %vm4335_vm14, %v2442_v55  ;;  %v1184_v32 = vsel %vm1181_vm8, %v1179_v63, %v1165_v33  ;;  %1499 = vmatmul.bf16.vlgmr.msra.gmra.mxu0 %v1196_v11  ;;  %v1185_v4 = vsel %vm1181_vm8, %v1180_v50, %v1166_v51  ;;  %vm4337_vm2 = vnez %v4262_v34  ;;  %vm4338_vm6 = vnez %v4264_v57 }
 0x195   : > { %1512 = vmatmul.bf16.vlgmr.msra.gmra.mxu1 %v1197_v43  ;;  %v1187_v8 = vpack.c.bf16 %v1185_v4, %v1184_v32  ;;  %vm4339_vm13 = vnez %v4267_v27  ;;  %vm4340_vm12 = vnez %v4269_v31  ;;  %vm4341_vm8 = vnez %v4273_v36 }
 0x196   : > { %1981 = vmatpush.bf16.msk.msrb.mxu2 %vm4336_vm11, %v2442_v55  ;;  %1951 = vmatpush.bf16.msk.msrb.mxu0 %vm4338_vm6, %v2442_v55  ;;  %vm4342_vm0 = vnez %v4277_v0  ;;  %vm4343_vm7 = vnez %v4282_v14  ;;  %vm4344_vm9 = vnez %v4286_v3  ;;  %vm4345_vm15 = vnez %v4291_v7 }
 0x197   : > { %1997 = vmatpush.bf16.msk.msrb.mxu3 %vm4337_vm2, %v2442_v55  ;;  %v1190_v15 = vunpack.c.l.bf16 %v1187_v8  ;;  %v1191_v37 = vunpack.c.h.bf16 %v1187_v8  ;;  %v1545_v27 = vunpack.c.l.b16 %v3951_v1  ;;  %vm4346_vm5 = vnez %v4305_v52 }
 0x198   : > { %1967 = vmatpush.bf16.msk.msrb.mxu1 %vm4339_vm13, %v2442_v55  ;;  %v1546_v31 = vunpack.c.h.b16 %v3951_v1  ;;  %vm4347_vm14 = vnez %v4309_v49  ;;  %vm4348_vm11 = vnez %v4313_v45  ;;  %v1547_v14 = vunpack.c.l.b16 %v1187_v8 }
 0x199   : > { %v1194_v46 = vsub.f32 %v1184_v32, %v1190_v15  ;;  %v1195_v12 = vsub.f32 %v1185_v4, %v1191_v37  ;;  %v1549_v36 = vpack.c.b16 %v1545_v27, %v1545_v27  ;;  %v1548_v3 = vunpack.c.h.b16 %v1187_v8 }
 0x19a   : > { %1983 = vmatpush.bf16.msk.msrb.mxu2 %vm4340_vm12, %v2442_v55  ;;  %1953 = vmatpush.bf16.msk.msrb.mxu0 %vm4342_vm0, %v2442_v55  ;;  %v1550_v0 = vpack.c.b16 %v1546_v31, %v1546_v31  ;;  %v1551_v7 = vpack.c.b16 %v1547_v14, %v1547_v14 }
 0x19b   : > { %1999 = vmatpush.bf16.msk.msrb.mxu3 %vm4341_vm8, %v2442_v55  ;;  %v1198_v34 = vpack.c.bf16 %v1194_v46, %v1194_v46  ;;  %v1199_v57 = vpack.c.bf16 %v1195_v12, %v1195_v12  ;;  %v1552_v29 = vpack.c.b16 %v1548_v3, %v1548_v3 }
 0x19c   : > { %1969 = vmatpush.bf16.msk.msrb.mxu1 %vm4343_vm7, %v2442_v55 }
 0x19d   : > { %1525 = vmatmul.bf16.vlgmr.msra.gmra.mxu2 %v1198_v34  ;;  %1538 = vmatmul.bf16.vlgmr.msra.gmra.mxu3 %v1199_v57 }
 0x19e   : > { %1985 = vmatpush.bf16.msk.msrb.mxu2 %vm4344_vm9, %v2442_v55  ;;  %1955 = vmatpush.bf16.msk.msrb.mxu0 %vm3806_vm3, %v2442_v55  ;;  %vm4349_vm3 = vnez %v4317_v6 }
 0x19f   : > { %2001 = vmatpush.bf16.msk.msrb.mxu3 %vm4345_vm15, %v2442_v55 }
 0x1a0   : > { %1971 = vmatpush.bf16.msk.msrb.mxu1 %vm3824_vm10, %v2442_v55 }
 0x1a2   : > { %1987 = vmatpush.bf16.msk.msrb.mxu2 %vm4346_vm5, %v2442_v55  ;;  %1957 = vmatpush.bf16.msk.msrb.mxu0 %vm4348_vm11, %v2442_v55 }
 0x1a3   : > { %2003 = vmatpush.bf16.msk.msrb.mxu3 %vm4347_vm14, %v2442_v55 }
 0x1a4   : > { %1973 = vmatpush.bf16.msk.msrb.mxu1 %vm4349_vm3, %v2442_v55 }
 0x1a5   : > { %1565 = vmatmul.bf16.vlgmr.msrb.gmra.mxu0 %v1549_v36 }
 0x1a6   : > { %1989 = vmatpush.bf16.msk.msrb.mxu2 %vm3898_vm1, %v2442_v55 }
 0x1a7   : > { %2005 = vmatpush.bf16.msk.msrb.mxu3 %vm3912_vm4, %v2442_v55  ;;  %1578 = vmatmul.bf16.vlgmr.msrb.gmra.mxu1 %v1550_v0 }
 0x1ad   : > { %1591 = vmatmul.bf16.vlgmr.msrb.gmra.mxu2 %v1551_v7  ;;  %1604 = vmatmul.bf16.vlgmr.msrb.gmra.mxu3 %v1552_v29 }
 0x211   : > { %v1500_v17 = vpop.f32.mrf.mxu0 }
 0x212   : > { %v1513_v52 = vpop.f32.mrf.mxu1 }
 0x213   : > { %v1514_v20 = vadd.f32 %v1513_v52, %v1500_v17 }
 0x219   : > { %v1502_v49 = vpop.f32.mrf.mxu0 }
 0x21a   : > { %v1515_v45 = vpop.f32.mrf.mxu1 }
 0x220   : > { %v1526_v6 = vpop.f32.mrf.mxu2  ;;  %v1539_v56 = vpop.f32.mrf.mxu3 }
 0x221   : > { %v1527_v10 = vadd.f32 %v1526_v6, %v1514_v20 }
 0x222   : > { %v1566_v59 = vpop.f32.mrf.mxu0 }
 0x223   : > { %v1540_v55 = vadd.f32 %v1539_v56, %v1527_v10 }
 0x224   : > { %v1579_v16 = vpop.f32.mrf.mxu1 }
 0x225   : > { %v1567_v42 = vadd.f32 %v1566_v59, %v1540_v55 }
 0x227   : > { %v1580_v9 = vadd.f32 %v1579_v16, %v1567_v42 }
 0x228   : > { %v1528_v54 = vpop.f32.mrf.mxu2  ;;  %v1541_v48 = vpop.f32.mrf.mxu3 }
 0x22a   : > { %v1568_v2 = vpop.f32.mrf.mxu0 }
 0x22c   : > { %v1581_v22 = vpop.f32.mrf.mxu1 }
 0x230   : > { %v1592_v62 = vpop.f32.mrf.mxu2  ;;  %v1605_v47 = vpop.f32.mrf.mxu3 }
 0x231   : > { %v1593_v1 = vadd.f32 %v1592_v62, %v1580_v9 }
 0x233   : > { %v1606_v23 = vadd.f32 %v1605_v47, %v1593_v1 }
 0x235   : > { %v1609_v44 = vadd.f32 %v1606_v23, %v1490_v35 }
 0x237   : > { %1610 = vst [vmem:[#allocation2] sm:$0xff] %v1609_v44 }
 0x238   : > { %v1594_v40 = vpop.f32.mrf.mxu2  ;;  %v1607_v30 = vpop.f32.mrf.mxu3 }
 0x239 PF: > { %s4350_s15 = sld [smem:[#allocation27_spill]] }
 0x23f   : > { %p2006_p13 = scmp.ne.s32.totalorder %s4350_s15, 25 }
 0x240   : > { %s4351_s17 = sld [smem:[#allocation39_spill]] (!%p2006_p13) }
 0x241   : > { %1614 = sbr.rel (%p2006_p13) target bundleno = 721 (0x2d1), region = 56 }
 0x246   : > { %v1617_v26 = vld [vmem:[#allocation2] sm:$0xff]  ;;  %vm1618_vm10 = vcmask 64512   ;;  %v1616_v19 = vld [vmem:[%s4351_s17 + $0x8] sm:$0xff] }
 0x247   : > { %v1615_v39 = vld [vmem:[%s4351_s17] sm:$0xff]  ;;  %1640 = vmatpush.msra.mxu0 %v1617_v26  ;;  %2015 = vmatpush.msra.mxu1 %v1617_v26 }
 0x248   : > { %2007 = vmatmul.msk.f32.vlgmr.msra.gmra.mxu0 %vm1618_vm10, %v1615_v39  ;;  %2008 = vmatmul.msk.f32.vlgmr.msra.gmra.mxu1 %vm1618_vm10, %v1616_v19 }
 0x2c5   : > { %v1642_v18 = vpop.f32.mrf.mxu0  ;;  %v1645_v21 = vpop.f32.mrf.mxu1 }
 0x2c6   : > { %v1648_v13 = vmul.f32 %v1642_v18, %v1642_v18  ;;  %v1649_v38 = vmul.f32 %v1645_v21, %v1645_v21 }
 0x2c8   : > { %v1651_v53 = vrot.slane %v1648_v13, 4  ;;  %v1656_v25 = vrot.slane %v1649_v38, 4 }
 0x2ca   : > { %v1653_v41 = vadd.f32 %v1651_v53, %v1648_v13 }
 0x2cc   : > { %v1654_v24 = vadd.f32 %v1653_v41, %v1649_v38 }
 0x2ce   : > { %v1658_v5 = vadd.f32 %v1656_v25, %v1654_v24 }
 0x2d0   : > { %1659 = vst [vmem:[%s326_s6] sm:$0xf] %v1658_v5 }
 0x2d1 PF: > { %s4352_s22 = sld [smem:[#allocation28_spill]]  ;;  %s1673_s23 = sshll.u32 %s326_s6, 4  ;;  %s1674_s23 = int_to_ptr.vmem [resolvable:$true] %s1673_s23 }
 0x2d2   : > { %s4353_s11 = sld [smem:[#allocation40_spill]]  ;;  %s1661_s9 = scalar_lea.sflag [#allocation8], %s324_s21 }
 0x2d7   : > { %s2010_s19 = sshll.u32 %s4352_s22, 2 }
 0x2d8   : > { %s4354_s5 = smov %s4353_s11  ;;  %s1671_s30 = scalar_lea.hbm %s4353_s11, %s2010_s19 }
 0x2d9   : > { %s1675_s26 = sshll.u32 %s1671_s30, 4  ;;  %s2295_s27 = scalar_lea.hbm %s4354_s5, 8  ;;  %s1676_s26 = int_to_ptr.hbm [resolvable:$true] %s1675_s26 }
 0x2da   : > { %s2289_s12 = sshra.s32 %s1676_s26, 4  ;;  %s2290_s12 = int_to_ptr.hbm [resolvable:$true] %s2289_s12 }
 0x2db   : > { %s2291_s25 = scalar_lea.hbm %s2290_s12, 4  ;;  %p2296_p2 = scmp.lt.s32.totalorder %s2290_s12, %s4354_s5 }
 0x2dc   : > { %p2292_p0 = scmp.ne.s32.totalorder %s2290_s12, %s2291_s25  ;;  %p2297_p4 = scmp.lt.s32.totalorder %s2295_s27, %s2291_s25 }
 0x2de   : > { %p2293_p11 = pnand %p2292_p0, %p2626_p9  ;;  %p2298_p5 = por %p2297_p4, %p2296_p2 }
 0x2e0   : > { %p2294_p1 = pneg %p2293_p11 }
 0x2e2   : > { %p2299_p3 = pnand %p2298_p5, %p2294_p1 }
 0x2e4   : > { %2302 = shalt.err (!%p2299_p3)
}
 0x2e5   : > { %2028 = dma.vmem_to_hbm [thread:$0]  (%p2626_p9), %s1674_s23, 64, %s1676_s26, %s1661_s9  }
 0x2e6 PF: > { %p2050_p6 = scmp.ge.s32.totalorder %s2427_s16, 2  ;;  %s1687_s21 = sand.u32 1, %s2375_s0  }
 0x2e7   : > { %p4355_p10 = scmp.ne.s32.totalorder %s4192_s2, 0  ;;  %s1688_s13 = scalar_lea.sflag [#allocation8], %s1687_s21 }
 0x2e9   : > { %p2046_p12 = pnand %p2050_p6, %p4355_p10 }
 0x2eb   : > { %p2047_p7 = pneg %p2046_p12 }
 0x2ed   : > { %2370 = dma.done.wait (%p2047_p7), %s1688_s13, 64  }
 0x2ee   : > { %2372 = vsyncadd (%p2047_p7), %s1688_s13, 4294967232  ;;  %s38_s16 = sadd.s32 1, %s2427_s16   ;;  %s4357_s10 = sld [smem:[#allocation34_spill]] }
 0x2ef   : > { %p4075_p8 = scmp.ge.s32.totalorder %s38_s16, 54   ;;  %s4358_s4 = sld [smem:[#allocation24_spill]] }
 0x2f0   : > { %s4359_s8 = sld [smem:[#allocation35_spill]]  ;;  %s4366_s0 = smov %s2379_s29 }
 0x2f1   : > { %s4360_s9 = sld [smem:[#allocation25_spill]]  ;;  %s4367_s29 = smov %s2383_s1 }
 0x2f2   : > { %s4361_s22 = sld [smem:[#allocation26_spill]]  ;;  %s4369_s30 = smov %s2391_s7 }
 0x2f3   : > { %s4362_s11 = sld [smem:[#allocation33_spill]]  ;;  %s4372_s12 = smov %s2419_s14 }
 0x2f4   : > { %s4363_s13 = sld [smem:[#allocation29_spill]]  ;;  %s4368_s1 = smov %s4357_s10 }
 0x2f5   : > { %s4364_s2 = sld [smem:[#allocation30_spill]]  ;;  %s4370_s7 = smov %s4358_s4 }
 0x2f6   : > { %s4365_s15 = sld [smem:[#allocation31_spill]] }
 0x2f7   :  { %37 = sbr.rel (!%p4075_p8) target bundleno = 23 (0x17), region = 106 }
 0x2f8   : > { %s4371_s10 = smov %s4361_s22 }
 0x2fb   : > { %s4373_s14 = smov %s4364_s2 }
 0x2fc   :  { %1694 = vsyncpa [#allocation7], 1 }
 0x2fd   :  { %1696 = vsyncpa [#allocation7 + $0x1], 1 }
 0x2fe   :  { %1697 = vsyncpa [#allocation10], 1 }
 0x2ff   :  { %1699 = vsyncpa [#allocation10 + $0x1], 1 }
 0x300   :  { %1700 = vsyncpa [#allocation8], 1 }
 0x301   :  { %1702 = vsyncpa [#allocation8 + $0x1], 1 }

</bundles_post_ra>
